<compile_context>
chip_gen: v7x
topology: tpu7x:2x2x1
jax: 0.10.0
libtpu: 0.0.40
codegen_flags: <defaults>
</compile_context>

<pallas_src>
import functools

import jax
import jax.numpy as jnp
from jax.experimental import pallas as pl
from jax.experimental.pallas import tpu as pltpu


# ----------------------------------------------------------------------------
# math helpers
# ----------------------------------------------------------------------------
def _bce(pred, target):
    # clipped BCE, matches YoloLoss.BCELoss / clip_by_tensor (used by the ref)
    eps = 1e-7
    p = jnp.clip(pred, eps, 1.0 - eps)
    return -target * jnp.log(p) - (1.0 - target) * jnp.log(1.0 - p)


def _bce_logits(x, t):
    # BCE(sigmoid(x), t) in logits form: max(x,0) - x*t + log(1 + exp(-|x|))
    return jnp.maximum(x, 0.0) - x * t + jnp.log(1.0 + jnp.exp(-jnp.abs(x)))


# ----------------------------------------------------------------------------
# Pallas kernel: one (R, 128)-location tile of the fused, all-level YOLOv3 loss
# ----------------------------------------------------------------------------
def _yolo_fused_kernel(raw_ref, yt_ref, cst_ref, tb_ref, out_ref, *, num_boxes):
    f32 = jnp.float32

    # per-location constants (shared over batch; (R,128) broadcasts to (B,R,128))
    gx, gy = cst_ref[0], cst_ref[1]          # grid cell x / y
    igw, igh = cst_ref[2], cst_ref[3]        # 1/grid_w, 1/grid_h
    awn, ahn = cst_ref[4], cst_ref[5]        # anchor_w/in_w, anchor_h/in_h
    valid = cst_ref[6]                       # 1 for real locations, 0 for padding

    # per-channel reads: contiguous sub-blocks of the (B, C, R, 128) tiles
    raw_x, raw_y = raw_ref[:, 0], raw_ref[:, 1]
    raw_w, raw_h = raw_ref[:, 2], raw_ref[:, 3]
    raw_c = raw_ref[:, 4]

    true_x, true_y = yt_ref[:, 0], yt_ref[:, 1]      # grid-encoded xy targets
    true_w, true_h = yt_ref[:, 2], yt_ref[:, 3]      # log-encoded wh targets
    obj = yt_ref[:, 4]
    pos = yt_ref[:, 5]                               # obj * (2 - w*h), precomputed

    # ---- xy: share exp(-|x|) between sigmoid (box decode) and logits-BCE ----
    ex = jnp.exp(-jnp.abs(raw_x))
    ey = jnp.exp(-jnp.abs(raw_y))
    rx = 1.0 / (1.0 + ex)
    ry = 1.0 / (1.0 + ey)
    sig_x = jnp.where(raw_x >= 0.0, rx, ex * rx)
    sig_y = jnp.where(raw_y >= 0.0, ry, ey * ry)
    bce_x = jnp.maximum(raw_x, 0.0) - raw_x * true_x + jnp.log(1.0 + ex)
    bce_y = jnp.maximum(raw_y, 0.0) - raw_y * true_y + jnp.log(1.0 + ey)

    # ---- decode predicted boxes (normalized); clamp wh logits so the IoU ----
    # ---- test never sees inf*0 NaNs at saturated logits                  ----
    box_x = (sig_x + gx) * igw
    box_y = (sig_y + gy) * igh
    box_w = jnp.exp(jnp.minimum(raw_w, 30.0)) * awn
    box_h = jnp.exp(jnp.minimum(raw_h, 30.0)) * ahn
    area_p = box_w * box_h
    px0 = box_x - 0.5 * box_w
    px1 = box_x + 0.5 * box_w
    py0 = box_y - 0.5 * box_h
    py1 = box_y + 0.5 * box_h

    # ---- negative mask: division-free "all IoU < 0.5" over the N gt boxes ----
    # iou < 0.5  <=>  3*inter < area_pred + area_true
    tb = tb_ref[...]                                   # (B, 5*N + 1)
    score = jnp.full_like(box_x, -1.0)                 # max_n 3*inter - (areas)
    # TODO(synk): for large N (>=16), switch to lax.fori_loop(..., unroll=4)
    # with pl.ds reads of tb to cap register pressure / compile time.
    for n in range(num_boxes):
        tx0 = tb[:, 5 * n + 0][:, None, None]
        tx1 = tb[:, 5 * n + 1][:, None, None]
        ty0 = tb[:, 5 * n + 2][:, None, None]
        ty1 = tb[:, 5 * n + 3][:, None, None]
        ta = tb[:, 5 * n + 4][:, None, None]
        iw = jnp.maximum(jnp.minimum(px1, tx1) - jnp.maximum(px0, tx0), 0.0)
        ih = jnp.maximum(jnp.minimum(py1, ty1) - jnp.maximum(py0, ty0), 0.0)
        score = jnp.maximum(score, 3.0 * (iw * ih) - (area_p + ta))
    has_box = tb[:, 5 * num_boxes][:, None, None]      # (B, 1, 1), precomputed
    neg_mask = (1.0 - obj) * (score < 0.0).astype(f32) * has_box * valid

    # ---- losses (logits-form BCE; wh is 0.5 * MSE on the raw logits) ----
    bce_c = _bce_logits(raw_c, obj)
    l_wh = 0.5 * ((raw_w - true_w) ** 2 + (raw_h - true_h) ** 2)

    # TODO(synk): for production num_classes (e.g. 80), gather the handful of
    # positive locations (scalar prefetch) and compute the cls BCE only there.
    raw_cls = raw_ref[:, 5:]                           # (B, nc, R, 128)
    yt_cls = yt_ref[:, 6:]
    cls_sum = jnp.sum(_bce_logits(raw_cls, yt_cls), axis=1)   # (B, R, 128)

    total = pos * (bce_x + bce_y + l_wh) + (obj + neg_mask) * bce_c + obj * cls_sum
    # lane-dense, unmasked partial-sum store; scalar reduction happens outside
    out_ref[...] = jnp.sum(total, axis=0)              # (R, 128)


# ----------------------------------------------------------------------------
# wrapper: layout plumbing + target pre-encoding + single fused pallas_call
# ----------------------------------------------------------------------------
def yolo_loss_pallas(y_pred, target, y_true, anchors, anchor_mask, input_shape,
                     *, rows_per_tile=8):
    B = y_pred[0].shape[0]
    C = y_pred[0].shape[1] // 3
    in_h, in_w = float(input_shape[0]), float(input_shape[1])

    raw_parts, yt_parts, cst_parts = [], [], []
    for lvl in range(len(y_pred)):
        p = y_pred[lvl].astype(jnp.float32)
        _, _, H, W = p.shape
        HW = H * W
        anch = anchors[jnp.array(anchor_mask[lvl])].astype(jnp.float32)   # (3, 2)

        # raw predictions: (B, 3C, H, W) -> (B, C, 3*HW), anchor-major locations
        # TODO(synk): on v5e keep the anchor axis as an outer block dim (skip
        # this permute) and stream raw/yt in bf16 to cut HBM traffic.
        raw_parts.append(
            jnp.transpose(p.reshape(B, 3, C, HW), (0, 2, 1, 3)).reshape(B, C, 3 * HW))

        # pre-encode targets here so the dense kernel drops logs/selects
        yt = y_true[lvl].astype(jnp.float32)                              # (B,3,H,W,C)
        gxx = jnp.arange(W, dtype=jnp.float32)[None, None, None, :]
        gyy = jnp.arange(H, dtype=jnp.float32)[None, None, :, None]
        aw = anch[:, 0][None, :, None, None]
        ah = anch[:, 1][None, :, None, None]
        obj = yt[..., 4]
        tx = yt[..., 0] * float(W) - gxx
        ty = yt[..., 1] * float(H) - gyy
        tw = jnp.where(obj > 0, jnp.log(jnp.maximum(yt[..., 2] * in_w / aw, 1e-12)), 0.0)
        th = jnp.where(obj > 0, jnp.log(jnp.maximum(yt[..., 3] * in_h / ah, 1e-12)), 0.0)
        pos = obj * (2.0 - yt[..., 2] * yt[..., 3])
        yt2 = jnp.concatenate(
            [tx[..., None], ty[..., None], tw[..., None], th[..., None],
             obj[..., None], pos[..., None], yt[..., 5:]], axis=-1)        # (B,3,H,W,C+1)
        yt_parts.append(
            jnp.transpose(yt2.reshape(B, 3, HW, C + 1), (0, 3, 1, 2)).reshape(B, C + 1, 3 * HW))

        # per-location constants (7 rows): gx, gy, 1/W, 1/H, aw/in_w, ah/in_h, valid
        gy2, gx2 = jnp.meshgrid(jnp.arange(H, dtype=jnp.float32),
                                jnp.arange(W, dtype=jnp.float32), indexing="ij")
        gxf = jnp.tile(gx2.reshape(1, HW), (3, 1)).reshape(3 * HW)
        gyf = jnp.tile(gy2.reshape(1, HW), (3, 1)).reshape(3 * HW)
        awf = jnp.repeat(anch[:, 0], HW) / in_w
        ahf = jnp.repeat(anch[:, 1], HW) / in_h
        ones = jnp.ones((3 * HW,), jnp.float32)
        cst_parts.append(jnp.stack([gxf, gyf, ones / float(W), ones / float(H),
                                    awf, ahf, ones], axis=0))              # (7, 3*HW)

    raw = jnp.concatenate(raw_parts, axis=-1)
    yt = jnp.concatenate(yt_parts, axis=-1)
    cst = jnp.concatenate(cst_parts, axis=-1)
    M = raw.shape[-1]

    R = rows_per_tile
    tile = R * 128
    num_tiles = -(-M // tile)
    m_pad = num_tiles * tile
    if m_pad != M:
        raw = jnp.pad(raw, ((0, 0), (0, 0), (0, m_pad - M)))
        yt = jnp.pad(yt, ((0, 0), (0, 0), (0, m_pad - M)))
        cst = jnp.pad(cst, ((0, 0), (0, m_pad - M)))      # valid row padded with 0

    r_tot = m_pad // 128
    raw = raw.reshape(B, C, r_tot, 128)
    yt = yt.reshape(B, C + 1, r_tot, 128)
    cst = cst.reshape(7, r_tot, 128)

    # raw gt boxes -> per-box corners + area + per-image has_box flag (precomputed)
    N = target.shape[1]
    boxes = target[..., :4].astype(jnp.float32)           # (B, N, 4): x, y, w, h
    x0 = boxes[..., 0] - 0.5 * boxes[..., 2]
    x1 = boxes[..., 0] + 0.5 * boxes[..., 2]
    y0 = boxes[..., 1] - 0.5 * boxes[..., 3]
    y1 = boxes[..., 1] + 0.5 * boxes[..., 3]
    area = boxes[..., 2] * boxes[..., 3]
    tb = jnp.stack([x0, x1, y0, y1, area], axis=-1).reshape(B, 5 * N)
    has_box = (jnp.sum(jnp.abs(boxes), axis=(1, 2)) > 0).astype(jnp.float32)[:, None]
    tb = jnp.concatenate([tb, has_box], axis=-1)           # (B, 5*N + 1)

    kern = functools.partial(_yolo_fused_kernel, num_boxes=N)
    out = pl.pallas_call(
        kern,
        out_shape=jax.ShapeDtypeStruct((num_tiles * R, 128), jnp.float32),
        grid=(num_tiles,),
        in_specs=[
            pl.BlockSpec((B, C, R, 128), lambda t: (0, 0, t, 0)),
            pl.BlockSpec((B, C + 1, R, 128), lambda t: (0, 0, t, 0)),
            pl.BlockSpec((7, R, 128), lambda t: (0, t, 0)),
            pl.BlockSpec((B, 5 * N + 1), lambda t: (0, 0)),   # tiny, stays resident
        ],
        out_specs=pl.BlockSpec((R, 128), lambda t: (t, 0)),
        compiler_params=pltpu.CompilerParams(
            dimension_semantics=("parallel",),
            # headroom for bigger tiles at production sizes; still within
            # v7x's 64 MiB physical VMEM per TensorCore
            vmem_limit_bytes=64 * 1024 * 1024),
    )(raw, yt, cst, tb)
    # lane-dense per-tile partial sums -> scalar
    return jnp.sum(out)


# ----------------------------------------------------------------------------
# pure-JAX reference (mirrors the PyTorch forward) for a correctness check
# ----------------------------------------------------------------------------
def yolo_loss_ref(y_pred, target, y_true, anchors, anchor_mask, input_shape):
    total = jnp.float32(0.0)
    for i in range(len(y_pred)):
        p = y_pred[i]
        B, C3, H, W = p.shape
        C = C3 // 3
        pred = jnp.transpose(p.reshape(B, 3, C, H, W), (0, 1, 3, 4, 2))    # (B,3,H,W,C)
        yt = y_true[i]
        anch = anchors[jnp.array(anchor_mask[i])].reshape(1, 3, 1, 1, 2)
        gy, gx = jnp.meshgrid(jnp.arange(H), jnp.arange(W), indexing="ij")
        gxy = jnp.stack([gx, gy], -1).astype(jnp.float32)[None, None]      # (1,1,H,W,2)
        grid_wh = jnp.array([W, H], jnp.float32)
        in_wh = jnp.array([input_shape[1], input_shape[0]], jnp.float32)

        obj = yt[..., 4:5]
        pred_xy = jax.nn.sigmoid(pred[..., 0:2])
        pred_wh = pred[..., 2:4]
        pred_conf = jax.nn.sigmoid(pred[..., 4:5])
        pred_cls = jax.nn.sigmoid(pred[..., 5:])
        box_xy = (pred_xy + gxy) / grid_wh
        box_wh = jnp.exp(pred_wh) * anch / in_wh
        pbox = jnp.concatenate([box_xy, box_wh], -1)

        true_xy = yt[..., 0:2] * grid_wh - gxy
        true_wh = jnp.log(yt[..., 2:4] * in_wh / anch)
        true_wh = jnp.where(obj > 0, true_wh, jnp.zeros_like(true_wh))
        loss_scale = 2.0 - yt[..., 2:3] * yt[..., 3:4]

        tbb = target[..., :4]
        p1 = pbox.reshape(B, -1, 1, 4)
        t1 = tbb.reshape(B, 1, -1, 4)
        p_min, p_max = p1[..., :2] - p1[..., 2:] * 0.5, p1[..., :2] + p1[..., 2:] * 0.5
        t_min, t_max = t1[..., :2] - t1[..., 2:] * 0.5, t1[..., :2] + t1[..., 2:] * 0.5
        iwh = jnp.maximum(jnp.minimum(p_max, t_max) - jnp.maximum(p_min, t_min), 0.0)
        inter = iwh[..., 0] * iwh[..., 1]
        iou = inter / (p1[..., 2] * p1[..., 3] + t1[..., 2] * t1[..., 3] - inter)
        best = jnp.max(iou, -1).reshape(B, 3, H, W, 1)
        has_box = (jnp.sum(jnp.abs(tbb), axis=(1, 2)) > 0).astype(jnp.float32).reshape(B, 1, 1, 1, 1)
        neg_mask = (1.0 - obj) * (best < 0.5).astype(jnp.float32) * has_box

        bce_conf = _bce(pred_conf, obj)
        l = (jnp.sum(obj * loss_scale * _bce(pred_xy, true_xy))
             + jnp.sum(obj * loss_scale * 0.5 * (pred_wh - true_wh) ** 2)
             + jnp.sum(obj * bce_conf) + jnp.sum(neg_mask * bce_conf)
             + jnp.sum(obj * _bce(pred_cls, yt[..., 5:])))
        total = total + l
    return total


# ----------------------------------------------------------------------------
# demo
# ----------------------------------------------------------------------------
if __name__ == "__main__":
    key = jax.random.PRNGKey(0)
    num_classes = 3
    C = 5 + num_classes
    B = 2
    input_shape = (128, 128)                 # (h, w)
    grids = [4, 8, 16]                       # strides 32 / 16 / 8
    anchors = jnp.array([[8, 10], [12, 16], [20, 24],
                         [28, 36], [40, 48], [56, 64],
                         [72, 80], [96, 104], [112, 120]], jnp.float32)
    anchor_mask = [[6, 7, 8], [3, 4, 5], [0, 1, 2]]

    keys = jax.random.split(key, len(grids))
    y_pred = [0.5 * jax.random.normal(keys[i], (B, 3 * C, g, g), jnp.float32)
              for i, g in enumerate(grids)]

    # encoded ground truth y_true[i]: (B, 3, g, g, 5+nc), one object per image/level
    y_true = []
    for li, g in enumerate(grids):
        yt = jnp.zeros((B, 3, g, g, C), jnp.float32)
        for b in range(B):
            a = (b + li) % 3
            r = (b + 1) % g
            c = (li + 1) % g
            yt = yt.at[b, a, r, c, 0].set((c + 0.5) / g)
            yt = yt.at[b, a, r, c, 1].set((r + 0.5) / g)
            yt = yt.at[b, a, r, c, 2].set(0.25)
            yt = yt.at[b, a, r, c, 3].set(0.30)
            yt = yt.at[b, a, r, c, 4].set(1.0)
            yt = yt.at[b, a, r, c, 5 + (b % num_classes)].set(1.0)
        y_true.append(yt)

    # raw ground-truth boxes target: (B, N, 5) = (x, y, w, h, class), zero-padded
    N = 4
    target = jnp.zeros((B, N, 5), jnp.float32)
    target = target.at[0, 0].set(jnp.array([0.30, 0.40, 0.25, 0.30, 1.0]))
    target = target.at[0, 1].set(jnp.array([0.70, 0.60, 0.20, 0.15, 2.0]))
    target = target.at[1, 0].set(jnp.array([0.50, 0.50, 0.30, 0.25, 0.0]))

    loss = yolo_loss_pallas(y_pred, target, y_true, anchors, anchor_mask, input_shape)
    loss = jax.block_until_ready(loss)

    ref = jax.block_until_ready(
        yolo_loss_ref(y_pred, target, y_true, anchors, anchor_mask, input_shape))

    assert bool(jnp.isfinite(loss)), f"non-finite loss: {loss}"
    assert bool(jnp.allclose(loss, ref, rtol=5e-3, atol=5e-2)), (loss, ref)
    print("KERNEL_OK")
</pallas_src>

<mosaic_0001>
module attributes {stable_mosaic.version = 11 : i64} {
  func.func @_yolo_fused_kernel(%arg0: i32, %arg1: memref<2x8x8x128xf32, #tpu.memory_space<vmem>>, %arg2: memref<2x9x8x128xf32, #tpu.memory_space<vmem>>, %arg3: memref<7x8x128xf32, #tpu.memory_space<vmem>>, %arg4: memref<2x21xf32, #tpu.memory_space<vmem>>, %arg5: memref<8x128xf32, #tpu.memory_space<vmem>>) attributes {dimension_semantics = [#tpu.dimension_semantics<parallel>], iteration_bounds = array<i64: 1>, scalar_prefetch = 0 : i64, scratch_operands = 0 : i64, tpu.core_type = #tpu.core_type<tc>, window_params = [{transform_indices = @transform_0, window_bounds = array<i64: 2, 8, 8, 128>}, {transform_indices = @transform_1, window_bounds = array<i64: 2, 9, 8, 128>}, {transform_indices = @transform_2, window_bounds = array<i64: 7, 8, 128>}, {pipeline_mode = #tpu.pipeline_mode<synchronous>, transform_indices = @transform_3, window_bounds = array<i64: 2, 21>}, {transform_indices = @transform_4, window_bounds = array<i64: 8, 128>}]} {
    %c0 = arith.constant 0 : index
    %c0_0 = arith.constant 0 : index
    %c0_1 = arith.constant 0 : index
    %0 = vector.load %arg3[%c0, %c0_0, %c0_1] : memref<7x8x128xf32, #tpu.memory_space<vmem>>, vector<1x8x128xf32>
    %1 = vector.shape_cast %0 : vector<1x8x128xf32> to vector<8x128xf32>
    %c1 = arith.constant 1 : index
    %c0_2 = arith.constant 0 : index
    %c0_3 = arith.constant 0 : index
    %2 = vector.load %arg3[%c1, %c0_2, %c0_3] : memref<7x8x128xf32, #tpu.memory_space<vmem>>, vector<1x8x128xf32>
    %3 = vector.shape_cast %2 : vector<1x8x128xf32> to vector<8x128xf32>
    %c2 = arith.constant 2 : index
    %c0_4 = arith.constant 0 : index
    %c0_5 = arith.constant 0 : index
    %4 = vector.load %arg3[%c2, %c0_4, %c0_5] : memref<7x8x128xf32, #tpu.memory_space<vmem>>, vector<1x8x128xf32>
    %5 = vector.shape_cast %4 : vector<1x8x128xf32> to vector<8x128xf32>
    %c3 = arith.constant 3 : index
    %c0_6 = arith.constant 0 : index
    %c0_7 = arith.constant 0 : index
    %6 = vector.load %arg3[%c3, %c0_6, %c0_7] : memref<7x8x128xf32, #tpu.memory_space<vmem>>, vector<1x8x128xf32>
    %7 = vector.shape_cast %6 : vector<1x8x128xf32> to vector<8x128xf32>
    %c4 = arith.constant 4 : index
    %c0_8 = arith.constant 0 : index
    %c0_9 = arith.constant 0 : index
    %8 = vector.load %arg3[%c4, %c0_8, %c0_9] : memref<7x8x128xf32, #tpu.memory_space<vmem>>, vector<1x8x128xf32>
    %9 = vector.shape_cast %8 : vector<1x8x128xf32> to vector<8x128xf32>
    %c5 = arith.constant 5 : index
    %c0_10 = arith.constant 0 : index
    %c0_11 = arith.constant 0 : index
    %10 = vector.load %arg3[%c5, %c0_10, %c0_11] : memref<7x8x128xf32, #tpu.memory_space<vmem>>, vector<1x8x128xf32>
    %11 = vector.shape_cast %10 : vector<1x8x128xf32> to vector<8x128xf32>
    %c6 = arith.constant 6 : index
    %c0_12 = arith.constant 0 : index
    %c0_13 = arith.constant 0 : index
    %12 = vector.load %arg3[%c6, %c0_12, %c0_13] : memref<7x8x128xf32, #tpu.memory_space<vmem>>, vector<1x8x128xf32>
    %13 = vector.shape_cast %12 : vector<1x8x128xf32> to vector<8x128xf32>
    %c0_14 = arith.constant 0 : index
    %c0_15 = arith.constant 0 : index
    %c0_16 = arith.constant 0 : index
    %c0_17 = arith.constant 0 : index
    %14 = vector.load %arg1[%c0_14, %c0_15, %c0_16, %c0_17] : memref<2x8x8x128xf32, #tpu.memory_space<vmem>>, vector<2x1x8x128xf32>
    %15 = vector.shape_cast %14 : vector<2x1x8x128xf32> to vector<2x8x128xf32>
    %c0_18 = arith.constant 0 : index
    %c1_19 = arith.constant 1 : index
    %c0_20 = arith.constant 0 : index
    %c0_21 = arith.constant 0 : index
    %16 = vector.load %arg1[%c0_18, %c1_19, %c0_20, %c0_21] : memref<2x8x8x128xf32, #tpu.memory_space<vmem>>, vector<2x1x8x128xf32>
    %17 = vector.shape_cast %16 : vector<2x1x8x128xf32> to vector<2x8x128xf32>
    %c0_22 = arith.constant 0 : index
    %c2_23 = arith.constant 2 : index
    %c0_24 = arith.constant 0 : index
    %c0_25 = arith.constant 0 : index
    %18 = vector.load %arg1[%c0_22, %c2_23, %c0_24, %c0_25] : memref<2x8x8x128xf32, #tpu.memory_space<vmem>>, vector<2x1x8x128xf32>
    %19 = vector.shape_cast %18 : vector<2x1x8x128xf32> to vector<2x8x128xf32>
    %c0_26 = arith.constant 0 : index
    %c3_27 = arith.constant 3 : index
    %c0_28 = arith.constant 0 : index
    %c0_29 = arith.constant 0 : index
    %20 = vector.load %arg1[%c0_26, %c3_27, %c0_28, %c0_29] : memref<2x8x8x128xf32, #tpu.memory_space<vmem>>, vector<2x1x8x128xf32>
    %21 = vector.shape_cast %20 : vector<2x1x8x128xf32> to vector<2x8x128xf32>
    %c0_30 = arith.constant 0 : index
    %c4_31 = arith.constant 4 : index
    %c0_32 = arith.constant 0 : index
    %c0_33 = arith.constant 0 : index
    %22 = vector.load %arg1[%c0_30, %c4_31, %c0_32, %c0_33] : memref<2x8x8x128xf32, #tpu.memory_space<vmem>>, vector<2x1x8x128xf32>
    %23 = vector.shape_cast %22 : vector<2x1x8x128xf32> to vector<2x8x128xf32>
    %c0_34 = arith.constant 0 : index
    %c0_35 = arith.constant 0 : index
    %c0_36 = arith.constant 0 : index
    %c0_37 = arith.constant 0 : index
    %24 = vector.load %arg2[%c0_34, %c0_35, %c0_36, %c0_37] : memref<2x9x8x128xf32, #tpu.memory_space<vmem>>, vector<2x1x8x128xf32>
    %25 = vector.shape_cast %24 : vector<2x1x8x128xf32> to vector<2x8x128xf32>
    %c0_38 = arith.constant 0 : index
    %c1_39 = arith.constant 1 : index
    %c0_40 = arith.constant 0 : index
    %c0_41 = arith.constant 0 : index
    %26 = vector.load %arg2[%c0_38, %c1_39, %c0_40, %c0_41] : memref<2x9x8x128xf32, #tpu.memory_space<vmem>>, vector<2x1x8x128xf32>
    %27 = vector.shape_cast %26 : vector<2x1x8x128xf32> to vector<2x8x128xf32>
    %c0_42 = arith.constant 0 : index
    %c2_43 = arith.constant 2 : index
    %c0_44 = arith.constant 0 : index
    %c0_45 = arith.constant 0 : index
    %28 = vector.load %arg2[%c0_42, %c2_43, %c0_44, %c0_45] : memref<2x9x8x128xf32, #tpu.memory_space<vmem>>, vector<2x1x8x128xf32>
    %29 = vector.shape_cast %28 : vector<2x1x8x128xf32> to vector<2x8x128xf32>
    %c0_46 = arith.constant 0 : index
    %c3_47 = arith.constant 3 : index
    %c0_48 = arith.constant 0 : index
    %c0_49 = arith.constant 0 : index
    %30 = vector.load %arg2[%c0_46, %c3_47, %c0_48, %c0_49] : memref<2x9x8x128xf32, #tpu.memory_space<vmem>>, vector<2x1x8x128xf32>
    %31 = vector.shape_cast %30 : vector<2x1x8x128xf32> to vector<2x8x128xf32>
    %c0_50 = arith.constant 0 : index
    %c4_51 = arith.constant 4 : index
    %c0_52 = arith.constant 0 : index
    %c0_53 = arith.constant 0 : index
    %32 = vector.load %arg2[%c0_50, %c4_51, %c0_52, %c0_53] : memref<2x9x8x128xf32, #tpu.memory_space<vmem>>, vector<2x1x8x128xf32>
    %33 = vector.shape_cast %32 : vector<2x1x8x128xf32> to vector<2x8x128xf32>
    %c0_54 = arith.constant 0 : index
    %c5_55 = arith.constant 5 : index
    %c0_56 = arith.constant 0 : index
    %c0_57 = arith.constant 0 : index
    %34 = vector.load %arg2[%c0_54, %c5_55, %c0_56, %c0_57] : memref<2x9x8x128xf32, #tpu.memory_space<vmem>>, vector<2x1x8x128xf32>
    %35 = vector.shape_cast %34 : vector<2x1x8x128xf32> to vector<2x8x128xf32>
    %36 = math.absf %15 : vector<2x8x128xf32>
    %cst = arith.constant 0.000000e+00 : f32
    %37 = vector.broadcast %cst : f32 to vector<2x8x128xf32>
    %38 = arith.subf %37, %36 : vector<2x8x128xf32>
    %39 = math.exp %38 : vector<2x8x128xf32>
    %40 = math.absf %17 : vector<2x8x128xf32>
    %cst_58 = arith.constant 0.000000e+00 : f32
    %41 = vector.broadcast %cst_58 : f32 to vector<2x8x128xf32>
    %42 = arith.subf %41, %40 : vector<2x8x128xf32>
    %43 = math.exp %42 : vector<2x8x128xf32>
    %cst_59 = arith.constant 1.000000e+00 : f32
    %44 = vector.broadcast %cst_59 : f32 to vector<2x8x128xf32>
    %45 = arith.addf %44, %39 : vector<2x8x128xf32>
    %cst_60 = arith.constant 1.000000e+00 : f32
    %46 = vector.broadcast %cst_60 : f32 to vector<2x8x128xf32>
    %47 = arith.divf %46, %45 : vector<2x8x128xf32>
    %cst_61 = arith.constant 1.000000e+00 : f32
    %48 = vector.broadcast %cst_61 : f32 to vector<2x8x128xf32>
    %49 = arith.addf %48, %43 : vector<2x8x128xf32>
    %cst_62 = arith.constant 1.000000e+00 : f32
    %50 = vector.broadcast %cst_62 : f32 to vector<2x8x128xf32>
    %51 = arith.divf %50, %49 : vector<2x8x128xf32>
    %cst_63 = arith.constant 0.000000e+00 : f32
    %52 = vector.broadcast %cst_63 : f32 to vector<2x8x128xf32>
    %53 = arith.cmpf oge, %15, %52 : vector<2x8x128xf32>
    %54 = arith.mulf %39, %47 : vector<2x8x128xf32>
    %55 = arith.select %53, %47, %54 : vector<2x8x128xi1>, vector<2x8x128xf32>
    %cst_64 = arith.constant 0.000000e+00 : f32
    %56 = vector.broadcast %cst_64 : f32 to vector<2x8x128xf32>
    %57 = arith.cmpf oge, %17, %56 : vector<2x8x128xf32>
    %58 = arith.mulf %43, %51 : vector<2x8x128xf32>
    %59 = arith.select %57, %51, %58 : vector<2x8x128xi1>, vector<2x8x128xf32>
    %cst_65 = arith.constant 0.000000e+00 : f32
    %60 = vector.broadcast %cst_65 : f32 to vector<2x8x128xf32>
    %61 = arith.maximumf %15, %60 : vector<2x8x128xf32>
    %62 = arith.mulf %15, %25 : vector<2x8x128xf32>
    %63 = arith.subf %61, %62 : vector<2x8x128xf32>
    %cst_66 = arith.constant 1.000000e+00 : f32
    %64 = vector.broadcast %cst_66 : f32 to vector<2x8x128xf32>
    %65 = arith.addf %64, %39 : vector<2x8x128xf32>
    %66 = math.log %65 : vector<2x8x128xf32>
    %67 = arith.addf %63, %66 : vector<2x8x128xf32>
    %cst_67 = arith.constant 0.000000e+00 : f32
    %68 = vector.broadcast %cst_67 : f32 to vector<2x8x128xf32>
    %69 = arith.maximumf %17, %68 : vector<2x8x128xf32>
    %70 = arith.mulf %17, %27 : vector<2x8x128xf32>
    %71 = arith.subf %69, %70 : vector<2x8x128xf32>
    %cst_68 = arith.constant 1.000000e+00 : f32
    %72 = vector.broadcast %cst_68 : f32 to vector<2x8x128xf32>
    %73 = arith.addf %72, %43 : vector<2x8x128xf32>
    %74 = math.log %73 : vector<2x8x128xf32>
    %75 = arith.addf %71, %74 : vector<2x8x128xf32>
    %76 = vector.shape_cast %1 : vector<8x128xf32> to vector<1x8x128xf32>
    %77 = vector.broadcast %76 : vector<1x8x128xf32> to vector<2x8x128xf32>
    %78 = arith.addf %55, %77 : vector<2x8x128xf32>
    %79 = vector.shape_cast %5 : vector<8x128xf32> to vector<1x8x128xf32>
    %80 = vector.broadcast %79 : vector<1x8x128xf32> to vector<2x8x128xf32>
    %81 = arith.mulf %78, %80 : vector<2x8x128xf32>
    %82 = vector.shape_cast %3 : vector<8x128xf32> to vector<1x8x128xf32>
    %83 = vector.broadcast %82 : vector<1x8x128xf32> to vector<2x8x128xf32>
    %84 = arith.addf %59, %83 : vector<2x8x128xf32>
    %85 = vector.shape_cast %7 : vector<8x128xf32> to vector<1x8x128xf32>
    %86 = vector.broadcast %85 : vector<1x8x128xf32> to vector<2x8x128xf32>
    %87 = arith.mulf %84, %86 : vector<2x8x128xf32>
    %cst_69 = arith.constant 3.000000e+01 : f32
    %88 = vector.broadcast %cst_69 : f32 to vector<2x8x128xf32>
    %89 = arith.minimumf %19, %88 : vector<2x8x128xf32>
    %90 = math.exp %89 : vector<2x8x128xf32>
    %91 = vector.shape_cast %9 : vector<8x128xf32> to vector<1x8x128xf32>
    %92 = vector.broadcast %91 : vector<1x8x128xf32> to vector<2x8x128xf32>
    %93 = arith.mulf %90, %92 : vector<2x8x128xf32>
    %cst_70 = arith.constant 3.000000e+01 : f32
    %94 = vector.broadcast %cst_70 : f32 to vector<2x8x128xf32>
    %95 = arith.minimumf %21, %94 : vector<2x8x128xf32>
    %96 = math.exp %95 : vector<2x8x128xf32>
    %97 = vector.shape_cast %11 : vector<8x128xf32> to vector<1x8x128xf32>
    %98 = vector.broadcast %97 : vector<1x8x128xf32> to vector<2x8x128xf32>
    %99 = arith.mulf %96, %98 : vector<2x8x128xf32>
    %100 = arith.mulf %93, %99 : vector<2x8x128xf32>
    %cst_71 = arith.constant 5.000000e-01 : f32
    %101 = vector.broadcast %cst_71 : f32 to vector<2x8x128xf32>
    %102 = arith.mulf %101, %93 : vector<2x8x128xf32>
    %103 = arith.subf %81, %102 : vector<2x8x128xf32>
    %cst_72 = arith.constant 5.000000e-01 : f32
    %104 = vector.broadcast %cst_72 : f32 to vector<2x8x128xf32>
    %105 = arith.mulf %104, %93 : vector<2x8x128xf32>
    %106 = arith.addf %81, %105 : vector<2x8x128xf32>
    %cst_73 = arith.constant 5.000000e-01 : f32
    %107 = vector.broadcast %cst_73 : f32 to vector<2x8x128xf32>
    %108 = arith.mulf %107, %99 : vector<2x8x128xf32>
    %109 = arith.subf %87, %108 : vector<2x8x128xf32>
    %cst_74 = arith.constant 5.000000e-01 : f32
    %110 = vector.broadcast %cst_74 : f32 to vector<2x8x128xf32>
    %111 = arith.mulf %110, %99 : vector<2x8x128xf32>
    %112 = arith.addf %87, %111 : vector<2x8x128xf32>
    %c0_75 = arith.constant 0 : index
    %c0_76 = arith.constant 0 : index
    %113 = vector.load %arg4[%c0_75, %c0_76] : memref<2x21xf32, #tpu.memory_space<vmem>>, vector<2x21xf32>
    %cst_77 = arith.constant -1.000000e+00 : f32
    %114 = vector.broadcast %cst_77 : f32 to vector<2x8x128xf32>
    %115 = vector.extract_strided_slice %113 {offsets = [0, 0], sizes = [2, 1], strides = [1, 1]} : vector<2x21xf32> to vector<2x1xf32>
    %116 = vector.shape_cast %115 : vector<2x1xf32> to vector<2xf32>
    %117 = vector.shape_cast %116 : vector<2xf32> to vector<2x1x1xf32>
    %118 = vector.extract_strided_slice %113 {offsets = [0, 1], sizes = [2, 1], strides = [1, 1]} : vector<2x21xf32> to vector<2x1xf32>
    %119 = vector.shape_cast %118 : vector<2x1xf32> to vector<2xf32>
    %120 = vector.shape_cast %119 : vector<2xf32> to vector<2x1x1xf32>
    %121 = vector.extract_strided_slice %113 {offsets = [0, 2], sizes = [2, 1], strides = [1, 1]} : vector<2x21xf32> to vector<2x1xf32>
    %122 = vector.shape_cast %121 : vector<2x1xf32> to vector<2xf32>
    %123 = vector.shape_cast %122 : vector<2xf32> to vector<2x1x1xf32>
    %124 = vector.extract_strided_slice %113 {offsets = [0, 3], sizes = [2, 1], strides = [1, 1]} : vector<2x21xf32> to vector<2x1xf32>
    %125 = vector.shape_cast %124 : vector<2x1xf32> to vector<2xf32>
    %126 = vector.shape_cast %125 : vector<2xf32> to vector<2x1x1xf32>
    %127 = vector.extract_strided_slice %113 {offsets = [0, 4], sizes = [2, 1], strides = [1, 1]} : vector<2x21xf32> to vector<2x1xf32>
    %128 = vector.shape_cast %127 : vector<2x1xf32> to vector<2xf32>
    %129 = vector.shape_cast %128 : vector<2xf32> to vector<2x1x1xf32>
    %130 = vector.broadcast %120 : vector<2x1x1xf32> to vector<2x8x128xf32>
    %131 = arith.minimumf %106, %130 : vector<2x8x128xf32>
    %132 = vector.broadcast %117 : vector<2x1x1xf32> to vector<2x8x128xf32>
    %133 = arith.maximumf %103, %132 : vector<2x8x128xf32>
    %134 = arith.subf %131, %133 : vector<2x8x128xf32>
    %cst_78 = arith.constant 0.000000e+00 : f32
    %135 = vector.broadcast %cst_78 : f32 to vector<2x8x128xf32>
    %136 = arith.maximumf %134, %135 : vector<2x8x128xf32>
    %137 = vector.broadcast %126 : vector<2x1x1xf32> to vector<2x8x128xf32>
    %138 = arith.minimumf %112, %137 : vector<2x8x128xf32>
    %139 = vector.broadcast %123 : vector<2x1x1xf32> to vector<2x8x128xf32>
    %140 = arith.maximumf %109, %139 : vector<2x8x128xf32>
    %141 = arith.subf %138, %140 : vector<2x8x128xf32>
    %cst_79 = arith.constant 0.000000e+00 : f32
    %142 = vector.broadcast %cst_79 : f32 to vector<2x8x128xf32>
    %143 = arith.maximumf %141, %142 : vector<2x8x128xf32>
    %144 = arith.mulf %136, %143 : vector<2x8x128xf32>
    %cst_80 = arith.constant 3.000000e+00 : f32
    %145 = vector.broadcast %cst_80 : f32 to vector<2x8x128xf32>
    %146 = arith.mulf %145, %144 : vector<2x8x128xf32>
    %147 = vector.broadcast %129 : vector<2x1x1xf32> to vector<2x8x128xf32>
    %148 = arith.addf %100, %147 : vector<2x8x128xf32>
    %149 = arith.subf %146, %148 : vector<2x8x128xf32>
    %150 = arith.maximumf %114, %149 : vector<2x8x128xf32>
    %151 = vector.extract_strided_slice %113 {offsets = [0, 5], sizes = [2, 1], strides = [1, 1]} : vector<2x21xf32> to vector<2x1xf32>
    %152 = vector.shape_cast %151 : vector<2x1xf32> to vector<2xf32>
    %153 = vector.shape_cast %152 : vector<2xf32> to vector<2x1x1xf32>
    %154 = vector.extract_strided_slice %113 {offsets = [0, 6], sizes = [2, 1], strides = [1, 1]} : vector<2x21xf32> to vector<2x1xf32>
    %155 = vector.shape_cast %154 : vector<2x1xf32> to vector<2xf32>
    %156 = vector.shape_cast %155 : vector<2xf32> to vector<2x1x1xf32>
    %157 = vector.extract_strided_slice %113 {offsets = [0, 7], sizes = [2, 1], strides = [1, 1]} : vector<2x21xf32> to vector<2x1xf32>
    %158 = vector.shape_cast %157 : vector<2x1xf32> to vector<2xf32>
    %159 = vector.shape_cast %158 : vector<2xf32> to vector<2x1x1xf32>
    %160 = vector.extract_strided_slice %113 {offsets = [0, 8], sizes = [2, 1], strides = [1, 1]} : vector<2x21xf32> to vector<2x1xf32>
    %161 = vector.shape_cast %160 : vector<2x1xf32> to vector<2xf32>
    %162 = vector.shape_cast %161 : vector<2xf32> to vector<2x1x1xf32>
    %163 = vector.extract_strided_slice %113 {offsets = [0, 9], sizes = [2, 1], strides = [1, 1]} : vector<2x21xf32> to vector<2x1xf32>
    %164 = vector.shape_cast %163 : vector<2x1xf32> to vector<2xf32>
    %165 = vector.shape_cast %164 : vector<2xf32> to vector<2x1x1xf32>
    %166 = vector.broadcast %156 : vector<2x1x1xf32> to vector<2x8x128xf32>
    %167 = arith.minimumf %106, %166 : vector<2x8x128xf32>
    %168 = vector.broadcast %153 : vector<2x1x1xf32> to vector<2x8x128xf32>
    %169 = arith.maximumf %103, %168 : vector<2x8x128xf32>
    %170 = arith.subf %167, %169 : vector<2x8x128xf32>
    %cst_81 = arith.constant 0.000000e+00 : f32
    %171 = vector.broadcast %cst_81 : f32 to vector<2x8x128xf32>
    %172 = arith.maximumf %170, %171 : vector<2x8x128xf32>
    %173 = vector.broadcast %162 : vector<2x1x1xf32> to vector<2x8x128xf32>
    %174 = arith.minimumf %112, %173 : vector<2x8x128xf32>
    %175 = vector.broadcast %159 : vector<2x1x1xf32> to vector<2x8x128xf32>
    %176 = arith.maximumf %109, %175 : vector<2x8x128xf32>
    %177 = arith.subf %174, %176 : vector<2x8x128xf32>
    %cst_82 = arith.constant 0.000000e+00 : f32
    %178 = vector.broadcast %cst_82 : f32 to vector<2x8x128xf32>
    %179 = arith.maximumf %177, %178 : vector<2x8x128xf32>
    %180 = arith.mulf %172, %179 : vector<2x8x128xf32>
    %cst_83 = arith.constant 3.000000e+00 : f32
    %181 = vector.broadcast %cst_83 : f32 to vector<2x8x128xf32>
    %182 = arith.mulf %181, %180 : vector<2x8x128xf32>
    %183 = vector.broadcast %165 : vector<2x1x1xf32> to vector<2x8x128xf32>
    %184 = arith.addf %100, %183 : vector<2x8x128xf32>
    %185 = arith.subf %182, %184 : vector<2x8x128xf32>
    %186 = arith.maximumf %150, %185 : vector<2x8x128xf32>
    %187 = vector.extract_strided_slice %113 {offsets = [0, 10], sizes = [2, 1], strides = [1, 1]} : vector<2x21xf32> to vector<2x1xf32>
    %188 = vector.shape_cast %187 : vector<2x1xf32> to vector<2xf32>
    %189 = vector.shape_cast %188 : vector<2xf32> to vector<2x1x1xf32>
    %190 = vector.extract_strided_slice %113 {offsets = [0, 11], sizes = [2, 1], strides = [1, 1]} : vector<2x21xf32> to vector<2x1xf32>
    %191 = vector.shape_cast %190 : vector<2x1xf32> to vector<2xf32>
    %192 = vector.shape_cast %191 : vector<2xf32> to vector<2x1x1xf32>
    %193 = vector.extract_strided_slice %113 {offsets = [0, 12], sizes = [2, 1], strides = [1, 1]} : vector<2x21xf32> to vector<2x1xf32>
    %194 = vector.shape_cast %193 : vector<2x1xf32> to vector<2xf32>
    %195 = vector.shape_cast %194 : vector<2xf32> to vector<2x1x1xf32>
    %196 = vector.extract_strided_slice %113 {offsets = [0, 13], sizes = [2, 1], strides = [1, 1]} : vector<2x21xf32> to vector<2x1xf32>
    %197 = vector.shape_cast %196 : vector<2x1xf32> to vector<2xf32>
    %198 = vector.shape_cast %197 : vector<2xf32> to vector<2x1x1xf32>
    %199 = vector.extract_strided_slice %113 {offsets = [0, 14], sizes = [2, 1], strides = [1, 1]} : vector<2x21xf32> to vector<2x1xf32>
    %200 = vector.shape_cast %199 : vector<2x1xf32> to vector<2xf32>
    %201 = vector.shape_cast %200 : vector<2xf32> to vector<2x1x1xf32>
    %202 = vector.broadcast %192 : vector<2x1x1xf32> to vector<2x8x128xf32>
    %203 = arith.minimumf %106, %202 : vector<2x8x128xf32>
    %204 = vector.broadcast %189 : vector<2x1x1xf32> to vector<2x8x128xf32>
    %205 = arith.maximumf %103, %204 : vector<2x8x128xf32>
    %206 = arith.subf %203, %205 : vector<2x8x128xf32>
    %cst_84 = arith.constant 0.000000e+00 : f32
    %207 = vector.broadcast %cst_84 : f32 to vector<2x8x128xf32>
    %208 = arith.maximumf %206, %207 : vector<2x8x128xf32>
    %209 = vector.broadcast %198 : vector<2x1x1xf32> to vector<2x8x128xf32>
    %210 = arith.minimumf %112, %209 : vector<2x8x128xf32>
    %211 = vector.broadcast %195 : vector<2x1x1xf32> to vector<2x8x128xf32>
    %212 = arith.maximumf %109, %211 : vector<2x8x128xf32>
    %213 = arith.subf %210, %212 : vector<2x8x128xf32>
    %cst_85 = arith.constant 0.000000e+00 : f32
    %214 = vector.broadcast %cst_85 : f32 to vector<2x8x128xf32>
    %215 = arith.maximumf %213, %214 : vector<2x8x128xf32>
    %216 = arith.mulf %208, %215 : vector<2x8x128xf32>
    %cst_86 = arith.constant 3.000000e+00 : f32
    %217 = vector.broadcast %cst_86 : f32 to vector<2x8x128xf32>
    %218 = arith.mulf %217, %216 : vector<2x8x128xf32>
    %219 = vector.broadcast %201 : vector<2x1x1xf32> to vector<2x8x128xf32>
    %220 = arith.addf %100, %219 : vector<2x8x128xf32>
    %221 = arith.subf %218, %220 : vector<2x8x128xf32>
    %222 = arith.maximumf %186, %221 : vector<2x8x128xf32>
    %223 = vector.extract_strided_slice %113 {offsets = [0, 15], sizes = [2, 1], strides = [1, 1]} : vector<2x21xf32> to vector<2x1xf32>
    %224 = vector.shape_cast %223 : vector<2x1xf32> to vector<2xf32>
    %225 = vector.shape_cast %224 : vector<2xf32> to vector<2x1x1xf32>
    %226 = vector.extract_strided_slice %113 {offsets = [0, 16], sizes = [2, 1], strides = [1, 1]} : vector<2x21xf32> to vector<2x1xf32>
    %227 = vector.shape_cast %226 : vector<2x1xf32> to vector<2xf32>
    %228 = vector.shape_cast %227 : vector<2xf32> to vector<2x1x1xf32>
    %229 = vector.extract_strided_slice %113 {offsets = [0, 17], sizes = [2, 1], strides = [1, 1]} : vector<2x21xf32> to vector<2x1xf32>
    %230 = vector.shape_cast %229 : vector<2x1xf32> to vector<2xf32>
    %231 = vector.shape_cast %230 : vector<2xf32> to vector<2x1x1xf32>
    %232 = vector.extract_strided_slice %113 {offsets = [0, 18], sizes = [2, 1], strides = [1, 1]} : vector<2x21xf32> to vector<2x1xf32>
    %233 = vector.shape_cast %232 : vector<2x1xf32> to vector<2xf32>
    %234 = vector.shape_cast %233 : vector<2xf32> to vector<2x1x1xf32>
    %235 = vector.extract_strided_slice %113 {offsets = [0, 19], sizes = [2, 1], strides = [1, 1]} : vector<2x21xf32> to vector<2x1xf32>
    %236 = vector.shape_cast %235 : vector<2x1xf32> to vector<2xf32>
    %237 = vector.shape_cast %236 : vector<2xf32> to vector<2x1x1xf32>
    %238 = vector.broadcast %228 : vector<2x1x1xf32> to vector<2x8x128xf32>
    %239 = arith.minimumf %106, %238 : vector<2x8x128xf32>
    %240 = vector.broadcast %225 : vector<2x1x1xf32> to vector<2x8x128xf32>
    %241 = arith.maximumf %103, %240 : vector<2x8x128xf32>
    %242 = arith.subf %239, %241 : vector<2x8x128xf32>
    %cst_87 = arith.constant 0.000000e+00 : f32
    %243 = vector.broadcast %cst_87 : f32 to vector<2x8x128xf32>
    %244 = arith.maximumf %242, %243 : vector<2x8x128xf32>
    %245 = vector.broadcast %234 : vector<2x1x1xf32> to vector<2x8x128xf32>
    %246 = arith.minimumf %112, %245 : vector<2x8x128xf32>
    %247 = vector.broadcast %231 : vector<2x1x1xf32> to vector<2x8x128xf32>
    %248 = arith.maximumf %109, %247 : vector<2x8x128xf32>
    %249 = arith.subf %246, %248 : vector<2x8x128xf32>
    %cst_88 = arith.constant 0.000000e+00 : f32
    %250 = vector.broadcast %cst_88 : f32 to vector<2x8x128xf32>
    %251 = arith.maximumf %249, %250 : vector<2x8x128xf32>
    %252 = arith.mulf %244, %251 : vector<2x8x128xf32>
    %cst_89 = arith.constant 3.000000e+00 : f32
    %253 = vector.broadcast %cst_89 : f32 to vector<2x8x128xf32>
    %254 = arith.mulf %253, %252 : vector<2x8x128xf32>
    %255 = vector.broadcast %237 : vector<2x1x1xf32> to vector<2x8x128xf32>
    %256 = arith.addf %100, %255 : vector<2x8x128xf32>
    %257 = arith.subf %254, %256 : vector<2x8x128xf32>
    %258 = arith.maximumf %222, %257 : vector<2x8x128xf32>
    %259 = vector.extract_strided_slice %113 {offsets = [0, 20], sizes = [2, 1], strides = [1, 1]} : vector<2x21xf32> to vector<2x1xf32>
    %260 = vector.shape_cast %259 : vector<2x1xf32> to vector<2xf32>
    %261 = vector.shape_cast %260 : vector<2xf32> to vector<2x1x1xf32>
    %cst_90 = arith.constant 1.000000e+00 : f32
    %262 = vector.broadcast %cst_90 : f32 to vector<2x8x128xf32>
    %263 = arith.subf %262, %33 : vector<2x8x128xf32>
    %cst_91 = arith.constant 0.000000e+00 : f32
    %264 = vector.broadcast %cst_91 : f32 to vector<2x8x128xf32>
    %265 = arith.cmpf olt, %258, %264 : vector<2x8x128xf32>
    %266 = arith.extui %265 : vector<2x8x128xi1> to vector<2x8x128xi32>
    %267 = arith.sitofp %266 : vector<2x8x128xi32> to vector<2x8x128xf32>
    %268 = arith.mulf %263, %267 : vector<2x8x128xf32>
    %269 = vector.broadcast %261 : vector<2x1x1xf32> to vector<2x8x128xf32>
    %270 = arith.mulf %268, %269 : vector<2x8x128xf32>
    %271 = vector.shape_cast %13 : vector<8x128xf32> to vector<1x8x128xf32>
    %272 = vector.broadcast %271 : vector<1x8x128xf32> to vector<2x8x128xf32>
    %273 = arith.mulf %270, %272 : vector<2x8x128xf32>
    %cst_92 = arith.constant 0.000000e+00 : f32
    %274 = vector.broadcast %cst_92 : f32 to vector<2x8x128xf32>
    %275 = arith.maximumf %23, %274 : vector<2x8x128xf32>
    %276 = arith.mulf %23, %33 : vector<2x8x128xf32>
    %277 = arith.subf %275, %276 : vector<2x8x128xf32>
    %278 = math.absf %23 : vector<2x8x128xf32>
    %cst_93 = arith.constant 0.000000e+00 : f32
    %279 = vector.broadcast %cst_93 : f32 to vector<2x8x128xf32>
    %280 = arith.subf %279, %278 : vector<2x8x128xf32>
    %281 = math.exp %280 : vector<2x8x128xf32>
    %cst_94 = arith.constant 1.000000e+00 : f32
    %282 = vector.broadcast %cst_94 : f32 to vector<2x8x128xf32>
    %283 = arith.addf %282, %281 : vector<2x8x128xf32>
    %284 = math.log %283 : vector<2x8x128xf32>
    %285 = arith.addf %277, %284 : vector<2x8x128xf32>
    %286 = arith.subf %19, %29 : vector<2x8x128xf32>
    %287 = arith.mulf %286, %286 : vector<2x8x128xf32>
    %288 = arith.subf %21, %31 : vector<2x8x128xf32>
    %289 = arith.mulf %288, %288 : vector<2x8x128xf32>
    %290 = arith.addf %287, %289 : vector<2x8x128xf32>
    %cst_95 = arith.constant 5.000000e-01 : f32
    %291 = vector.broadcast %cst_95 : f32 to vector<2x8x128xf32>
    %292 = arith.mulf %291, %290 : vector<2x8x128xf32>
    %c0_96 = arith.constant 0 : index
    %c5_97 = arith.constant 5 : index
    %c0_98 = arith.constant 0 : index
    %c0_99 = arith.constant 0 : index
    %293 = vector.load %arg1[%c0_96, %c5_97, %c0_98, %c0_99] : memref<2x8x8x128xf32, #tpu.memory_space<vmem>>, vector<2x3x8x128xf32>
    %c0_100 = arith.constant 0 : index
    %c6_101 = arith.constant 6 : index
    %c0_102 = arith.constant 0 : index
    %c0_103 = arith.constant 0 : index
    %294 = vector.load %arg2[%c0_100, %c6_101, %c0_102, %c0_103] : memref<2x9x8x128xf32, #tpu.memory_space<vmem>>, vector<2x3x8x128xf32>
    %cst_104 = arith.constant 0.000000e+00 : f32
    %295 = vector.broadcast %cst_104 : f32 to vector<2x3x8x128xf32>
    %296 = arith.maximumf %293, %295 : vector<2x3x8x128xf32>
    %297 = arith.mulf %293, %294 : vector<2x3x8x128xf32>
    %298 = arith.subf %296, %297 : vector<2x3x8x128xf32>
    %299 = math.absf %293 : vector<2x3x8x128xf32>
    %cst_105 = arith.constant 0.000000e+00 : f32
    %300 = vector.broadcast %cst_105 : f32 to vector<2x3x8x128xf32>
    %301 = arith.subf %300, %299 : vector<2x3x8x128xf32>
    %302 = math.exp %301 : vector<2x3x8x128xf32>
    %cst_106 = arith.constant 1.000000e+00 : f32
    %303 = vector.broadcast %cst_106 : f32 to vector<2x3x8x128xf32>
    %304 = arith.addf %303, %302 : vector<2x3x8x128xf32>
    %305 = math.log %304 : vector<2x3x8x128xf32>
    %306 = arith.addf %298, %305 : vector<2x3x8x128xf32>
    %cst_107 = arith.constant dense<0.000000e+00> : vector<2x8x128xf32>
    %307 = vector.multi_reduction <add>, %306, %cst_107 [1] : vector<2x3x8x128xf32> to vector<2x8x128xf32>
    %308 = arith.addf %67, %75 : vector<2x8x128xf32>
    %309 = arith.addf %308, %292 : vector<2x8x128xf32>
    %310 = arith.mulf %35, %309 : vector<2x8x128xf32>
    %311 = arith.addf %33, %273 : vector<2x8x128xf32>
    %312 = arith.mulf %311, %285 : vector<2x8x128xf32>
    %313 = arith.addf %310, %312 : vector<2x8x128xf32>
    %314 = arith.mulf %33, %307 : vector<2x8x128xf32>
    %315 = arith.addf %313, %314 : vector<2x8x128xf32>
    %cst_108 = arith.constant dense<0.000000e+00> : vector<8x128xf32>
    %316 = vector.multi_reduction <add>, %315, %cst_108 [0] : vector<2x8x128xf32> to vector<8x128xf32>
    %c0_109 = arith.constant 0 : index
    %c0_110 = arith.constant 0 : index
    %317 = vector.load %arg5[%c0_109, %c0_110] : memref<8x128xf32, #tpu.memory_space<vmem>>, vector<8x128xf32>
    tpu.vector_store %arg5[%c0_109, %c0_110], %316 {strides = array<i32>} : memref<8x128xf32, #tpu.memory_space<vmem>>, vector<8x128xf32>,
    return
  }
  func.func @transform_0(%arg0: i32) -> (i32, i32, i32, i32) {
    %c0_i32 = arith.constant 0 : i32
    %c0_i32_0 = arith.constant 0 : i32
    %c0_i32_1 = arith.constant 0 : i32
    %c0_i32_2 = arith.constant 0 : i32
    return %c0_i32, %c0_i32_0, %arg0, %c0_i32_1 : i32, i32, i32, i32
  }
  func.func @transform_1(%arg0: i32) -> (i32, i32, i32, i32) {
    %c0_i32 = arith.constant 0 : i32
    %c0_i32_0 = arith.constant 0 : i32
    %c0_i32_1 = arith.constant 0 : i32
    %c0_i32_2 = arith.constant 0 : i32
    return %c0_i32, %c0_i32_0, %arg0, %c0_i32_1 : i32, i32, i32, i32
  }
  func.func @transform_2(%arg0: i32) -> (i32, i32, i32) {
    %c0_i32 = arith.constant 0 : i32
    %c0_i32_0 = arith.constant 0 : i32
    %c0_i32_1 = arith.constant 0 : i32
    return %c0_i32, %arg0, %c0_i32_0 : i32, i32, i32
  }
  func.func @transform_3(%arg0: i32) -> (i32, i32) {
    %c0_i32 = arith.constant 0 : i32
    %c0_i32_0 = arith.constant 0 : i32
    %c0_i32_1 = arith.constant 0 : i32
    return %c0_i32, %c0_i32_0 : i32, i32
  }
  func.func @transform_4(%arg0: i32) -> (i32, i32) {
    %c0_i32 = arith.constant 0 : i32
    %c0_i32_0 = arith.constant 0 : i32
    return %arg0, %c0_i32 : i32, i32
  }
}

</mosaic_0001>

<bundles_post_ra>
// kernel: tpu_custom_call.1
= control target key start
LH: loop header
LB: loop body
LE: loop exit
PB: predicated region body
PF: predicated region fallthrough
CT: control target
= control target key end

     0   :  { %9 = vsyncpa [#allocation3], 0  ;;  %s1431_s0 = inlined_call_operand.hbm [shape: f32[2,8,8,128], index: 0, kind: input, shape index: {}]   ;;  %s1432_s1 = inlined_call_operand.hbm [shape: f32[2,9,8,128], index: 1, kind: input, shape index: {}]   ;;  %s1433_s2 = inlined_call_operand.hbm [shape: f32[7,8,128], index: 2, kind: input, shape index: {}]   ;;  %s1434_s3 = inlined_call_operand.hbm [shape: f32[2,21], index: 3, kind: input, shape index: {}]   ;;  %s1435_s4 = inlined_call_operand.hbm [shape: f32[8,128], index: 4, kind: output, shape index: {}]  }
   0x1   :  { %10 = vsyncpa [#allocation6], 0 }
   0x2   :  { %11 = vsyncpa [#allocation9], 0 }
   0x3   :  { %12 = vsyncpa [#allocation4], 0  ;;  %s939_s15 = smov [#allocation5]   ;;  %s940_s17 = smov [#allocation2]  }
   0x4   :  { %s30_s16 = sshll.u32 %s939_s15, 4  ;;  %s18_s18 = sshll.u32 %s940_s17, 4  ;;  %s31_s16 = int_to_ptr.vmem [resolvable:$true] %s30_s16  ;;  %s994_s18 = int_to_ptr.vmem [resolvable:$true] %s18_s18 }
   0x5   :  { %s821_s21 = scalar_lea.hbm %s1432_s1, 2304 }
   0x6   :  { %p822_p0 = scmp.ne.s32.totalorder %s1432_s1, %s821_s21  ;;  %p825_p1 = scmp.lt.u32.totalorder %s821_s21, %s1432_s1 }
   0x8   :  { %p827_p2 = pnand %p825_p1, %p822_p0 }
   0xa   :  { %830 = shalt.err (!%p827_p2)
}
   0xb   :  { %s831_s26 = scalar_lea.vmem %s31_s16, 2304  ;;  %p836_p4 = scmp.lt.s32.totalorder %s31_s16, %s31_s16 }
   0xc   :  { %p832_p3 = scmp.ne.s32.totalorder %s31_s16, %s831_s26  ;;  %p837_p5 = scmp.lt.s32.totalorder %s831_s26, %s831_s26 }
   0xe   :  { %p838_p6 = por %p837_p5, %p836_p4 }
  0x10   :  { %p839_p7 = pnand %p838_p6, %p832_p3 }
  0x12   :  { %842 = shalt.err (!%p839_p7)
}
  0x13   :  { %s941_s27 = smov 128   ;;  %s942_s28 = smov 8  }
  0x14   :  { %36 = dma.hbm_to_vmem [thread:$0]  %s1432_s1, 2304, %s31_s16, [#allocation6], %s941_s27, %s941_s27, %s942_s28  }
  0x15   :  { %s843_s7 = scalar_lea.hbm %s1431_s0, 2048 }
  0x16   :  { %p844_p8 = scmp.ne.s32.totalorder %s1431_s0, %s843_s7  ;;  %p847_p9 = scmp.lt.u32.totalorder %s843_s7, %s1431_s0 }
  0x18   :  { %p849_p10 = pnand %p847_p9, %p844_p8 }
  0x1a   :  { %852 = shalt.err (!%p849_p10)
}
  0x1b   :  { %s853_s12 = scalar_lea.vmem %s994_s18, 2048  ;;  %p858_p12 = scmp.lt.s32.totalorder %s994_s18, %s994_s18 }
  0x1c   :  { %p854_p11 = scmp.ne.s32.totalorder %s994_s18, %s853_s12  ;;  %p859_p13 = scmp.lt.s32.totalorder %s853_s12, %s853_s12 }
  0x1e   :  { %p860_p0 = por %p859_p13, %p858_p12 }
  0x20   :  { %p861_p1 = pnand %p860_p0, %p854_p11 }
  0x22   :  { %864 = shalt.err (!%p861_p1)
}
  0x23   :  { %24 = dma.hbm_to_vmem [thread:$0]  %s1431_s0, 2048, %s994_s18, [#allocation3], %s941_s27, %s941_s27, %s942_s28  }
  0x24   :  { %s943_s14 = smov [#allocation7]   ;;  %s944_s16 = smov [#allocation8]  }
  0x25   :  { %s42_s15 = sshll.u32 %s943_s14, 4  ;;  %s55_s17 = sshll.u32 %s944_s16, 4  ;;  %s43_s15 = int_to_ptr.vmem [resolvable:$true] %s42_s15  ;;  %s56_s17 = int_to_ptr.vmem [resolvable:$true] %s55_s17 }
  0x26   :  { %s865_s21 = scalar_lea.hbm %s1433_s2, 896 }
  0x27   :  { %p866_p2 = scmp.ne.s32.totalorder %s1433_s2, %s865_s21  ;;  %p869_p3 = scmp.lt.u32.totalorder %s865_s21, %s1433_s2 }
  0x29   :  { %p871_p4 = pnand %p869_p3, %p866_p2 }
  0x2b   :  { %874 = shalt.err (!%p871_p4)
}
  0x2c   :  { %s875_s0 = scalar_lea.vmem %s43_s15, 896  ;;  %p880_p6 = scmp.lt.s32.totalorder %s43_s15, %s43_s15 }
  0x2d   :  { %p876_p5 = scmp.ne.s32.totalorder %s43_s15, %s875_s0  ;;  %p881_p7 = scmp.lt.s32.totalorder %s875_s0, %s875_s0 }
  0x2f   :  { %p882_p8 = por %p881_p7, %p880_p6 }
  0x31   :  { %p883_p9 = pnand %p882_p8, %p876_p5 }
  0x33   :  { %886 = shalt.err (!%p883_p9)
}
  0x34   :  { %48 = dma.hbm_to_vmem [thread:$0]  %s1433_s2, 896, %s43_s15, [#allocation6], %s941_s27, %s941_s27, %s942_s28  }
  0x35   :  { %s887_s5 = scalar_lea.hbm %s1434_s3, 32 }
  0x36   :  { %p888_p10 = scmp.ne.s32.totalorder %s1434_s3, %s887_s5  ;;  %p891_p11 = scmp.lt.u32.totalorder %s887_s5, %s1434_s3 }
  0x38   :  { %p893_p12 = pnand %p891_p11, %p888_p10 }
  0x3a   :  { %896 = shalt.err (!%p893_p12)
}
  0x3b   :  { %s897_s10 = scalar_lea.vmem %s56_s17, 32  ;;  %p902_p0 = scmp.lt.s32.totalorder %s56_s17, %s56_s17 }
  0x3c   :  { %p898_p13 = scmp.ne.s32.totalorder %s56_s17, %s897_s10  ;;  %p903_p1 = scmp.lt.s32.totalorder %s897_s10, %s897_s10 }
  0x3e   :  { %p904_p2 = por %p903_p1, %p902_p0 }
  0x40   :  { %p905_p3 = pnand %p904_p2, %p898_p13 }
  0x42   :  { %908 = shalt.err (!%p905_p3)
}
  0x43   :  { %58 = dma.hbm_to_vmem [thread:$0]  %s1434_s3, 32, %s56_s17, [#allocation9]  }
  0x44   :  { %931 = dma.done.wait [#allocation3], 2048  }
  0x45   :  { %932 = vsyncadd [#allocation3], 4294965248 }
  0x46   :  { %933 = dma.done.wait [#allocation6], 3200  }
  0x47   :  { %934 = vsyncadd [#allocation6], 4294964096 }
  0x48   :  { %935 = dma.done.wait [#allocation9], 32  }
  0x49   :  { %936 = vsyncadd [#allocation9], 4294967264  ;;  %v230_v0 = vlaneseq  ;;  %v945_v1 = vmov 0   ;;  %v946_v2 = vmov 1   ;;  %v947_v3 = vmov 1966171168  }
  0x4a   :  { %722 = vset.pattern.permute.xlu1 %v945_v1  ;;  %721 = vset.pattern.permute.xlu0 %v946_v2  ;;  %v228_v4 = vunpack.c.l.s4 %v947_v3  ;;  %v688_v9 = vld.sshfl [vmem:[#allocation8] sm:$0x11 pattern:$0x75316420]  ;;  %v948_v14 = vmov 2   ;;  %v949_v15 = vmov 3  }
  0x4b   :  { %v231_v5 = vshrl.u32 %v230_v0, 7  ;;  %v226_v12 = vcombine.high %v688_v9, %v688_v9  ;;  %v950_v17 = vmov 4   ;;  %v951_v18 = vmov 6   ;;  %v1091_v30 = vld [vmem:[#allocation2] sm:$0xff]  ;;  %v1096_v33 = vld [vmem:[#allocation2 + $0x8] sm:$0xff]  ;;  %v1111_v49 = vld [vmem:[#allocation2 + $0x10] sm:$0xff] }
  0x4c   :  { %v229_v6 = vunpack.c.0.s8 %v228_v4  ;;  %v952_v19 = vmov 5   ;;  %v953_v20 = vmov 7   ;;  %v954_v21 = vmov 11   ;;  %v1101_v36 = vld [vmem:[#allocation2 + $0x40] sm:$0xff]  ;;  %v1105_v41 = vld [vmem:[#allocation2 + $0x48] sm:$0xff]  ;;  %v1118_v54 = vld [vmem:[#allocation2 + $0x18] sm:$0xff] }
  0x4d   :  { %v243_v8 = vsub.s32 0, %v231_v5  ;;  %v955_v22 = vmov 8   ;;  %v956_v23 = vmov 13   ;;  %v957_v24 = vmov 12   ;;  %v1125_v60 = vld [vmem:[#allocation2 + $0x50] sm:$0xff]  ;;  %v1131_v0 = vld [vmem:[#allocation2 + $0x58] sm:$0xff] }
  0x4e   :  { %v232_v7 = vsub.s32 %v229_v6, %v231_v5  ;;  %v958_v25 = vmov 15   ;;  %v959_v26 = vmov 18   ;;  %v960_v27 = vmov 10   ;;  %s968_s3 = smov [#allocation10]  }
  0x4f   :  { %v961_v28 = vmov 9   ;;  %v962_v29 = vmov 14   ;;  %v115_v31 = vand.u32 2147483647, %v1091_v30  ;;  %v963_v32 = vmov 20   ;;  %s677_s28 = sshll.u32 %s968_s3, 4  ;;  %s678_s28 = int_to_ptr.vmem [resolvable:$true] %s677_s28 }
  0x50   :  { %v233_v10 = vrot.slane %v688_v9, %v232_v7  ;;  %v240_v13 = vrot.slane %v226_v12, %v232_v7  ;;  %v123_v35 = vand.u32 2147483647, %v1096_v33  ;;  %v964_v37 = vmov 16   ;;  %v79_v12 = vld [vmem:[#allocation7 + $0x20] sm:$0xff]  ;;  %s909_s11 = scalar_lea.vmem %s678_s28, 128  ;;  %p914_p5 = scmp.lt.s32.totalorder %s678_s28, %s678_s28 }
  0x51   :  { %v117_v34 = vsub.f32 0.0, %v115_v31  ;;  %v116_v40 = vand.u32 2147483647, %v1101_v36  ;;  %v124_v43 = vand.u32 2147483647, %v1105_v41  ;;  %v965_v52 = vmov 17   ;;  %p910_p4 = scmp.ne.s32.totalorder %s678_s28, %s909_s11  ;;  %p915_p6 = scmp.lt.s32.totalorder %s909_s11, %s909_s11 }
  0x52   :  { %v1058_v11 = vrot.slane %v233_v10, %v243_v8  ;;  %v1064_v16 = vrot.slane %v240_v13, %v243_v8  ;;  %v125_v39 = vsub.f32 0.0, %v123_v35  ;;  %v187_v53 = vmin.f32 %v1111_v49, 30.0  ;;  %v71_v10 = vld [vmem:[#allocation7] sm:$0xff] }
  0x53   :  { %v119_v38 = vmul.f32 1.442695, %v117_v34  ;;  %v118_v44 = vsub.f32 0.0, %v116_v40  ;;  %v126_v45 = vsub.f32 0.0, %v124_v43  ;;  %v195_v58 = vmin.f32 %v1118_v54, 30.0  ;;  %p916_p7 = por %p915_p6, %p914_p5 }
  0x54   :  { %260 = vperm.xlu1 %722, %v1058_v11   ;;  %250 = vperm.xlu0 %721, %v1058_v11   ;;  %v127_v42 = vmul.f32 1.442695, %v125_v39  ;;  %v189_v57 = vmul.f32 1.442695, %v187_v53  ;;  %v188_v63 = vmin.f32 %v1125_v60, 30.0  ;;  %v196_v3 = vmin.f32 %v1131_v0, 30.0 }
  0x55   :  { %757 = vpow2.f32 %v119_v38  ;;  %v121_v46 = vmul.f32 1.442695, %v118_v44  ;;  %v129_v47 = vmul.f32 1.442695, %v126_v45  ;;  %v197_v62 = vmul.f32 1.442695, %v195_v58  ;;  %p917_p8 = pnand %p916_p7, %p910_p4 }
  0x56   :  { %759 = vpow2.f32 %v127_v42  ;;  %v191_v5 = vmul.f32 1.442695, %v188_v63  ;;  %vm143_vm0 = vcmp.ge.f32.partialorder %v1091_v30, 0.0  ;;  %v199_v7 = vmul.f32 1.442695, %v196_v3 }
  0x57   :  { %761 = vpow2.f32 %v121_v46  ;;  %v966_v9 = vmov 19   ;;  %vm149_vm1 = vcmp.ge.f32.partialorder %v1096_v33, 0.0  ;;  %vm144_vm2 = vcmp.ge.f32.partialorder %v1101_v36, 0.0 }
  0x58   :  { %724 = vset.pattern.permute.xlu1 %v948_v14  ;;  %723 = vset.pattern.permute.xlu0 %v949_v15  ;;  %763 = vpow2.f32 %v129_v47  ;;  %vm150_vm3 = vcmp.ge.f32.partialorder %v1105_v41, 0.0 }
  0x59   :  { %284 = vperm.xlu1 %724, %v1058_v11   ;;  %274 = vperm.xlu0 %723, %v1058_v11  }
  0x5d   :  { %726 = vset.pattern.permute.xlu1 %v945_v1  ;;  %725 = vset.pattern.permute.xlu0 %v946_v2 }
  0x5e   :  { %264 = vperm.xlu1 %726, %v1064_v16   ;;  %254 = vperm.xlu0 %725, %v1064_v16  }
  0x5f   :  { %v758_v48 = vpop.eup %757 }
  0x60   :  { %v1113_v50 = vadd.f32 1.0, %v758_v48  ;;  %v760_v51 = vpop.eup %759 }
  0x61   :  { %v1120_v55 = vadd.f32 1.0, %v760_v51  ;;  %v762_v56 = vpop.eup %761 }
  0x62   :  { %727 = vset.pattern.permute.xlu1 %v949_v15  ;;  %728 = vset.pattern.permute.xlu0 %v948_v14  ;;  %765 = vrcp.f32 %v1113_v50  ;;  %v764_v59 = vpop.eup %763  ;;  %v1127_v61 = vadd.f32 1.0, %v762_v56 }
  0x63   :  { %278 = vperm.xlu1 %727, %v1064_v16   ;;  %288 = vperm.xlu0 %728, %v1064_v16   ;;  %767 = vrcp.f32 %v1120_v55  ;;  %v1133_v1 = vadd.f32 1.0, %v764_v59 }
  0x64   :  { %769 = vpow2.f32 %v189_v57 }
  0x65   :  { %771 = vrcp.f32 %v1127_v61 }
  0x66   :  { %773 = vpow2.f32 %v197_v62 }
  0x67   :  { %729 = vset.pattern.permute.xlu1 %v950_v17  ;;  %730 = vset.pattern.permute.xlu0 %v951_v18  ;;  %775 = vrcp.f32 %v1133_v1 }
  0x68   :  { %302 = vperm.xlu1 %729, %v1058_v11   ;;  %316 = vperm.xlu0 %730, %v1058_v11   ;;  %777 = vpow2.f32 %v191_v5 }
  0x69   :  { %779 = vpow2.f32 %v199_v7 }
  0x6c   :  { %306 = vperm.xlu1 %729, %v1064_v16   ;;  %733 = vset.pattern.permute.xlu0 %v952_v19  ;;  %v766_v2 = vpop.eup %765 }
  0x6d   :  { %330 = vperm.xlu0 %733, %v1064_v16   ;;  %v145_v4 = vmul.f32 %v766_v2, %v758_v48  ;;  %v768_v6 = vpop.eup %767 }
  0x6e   :  { %v770_v8 = vpop.eup %769  ;;  %v151_v14 = vmul.f32 %v768_v6, %v760_v51 }
  0x6f   :  { %v147_v13 = vsel %vm143_vm0, %v766_v2, %v145_v4  ;;  %v772_v15 = vpop.eup %771 }
  0x70   :  { %731 = vset.pattern.permute.xlu1 %v951_v18  ;;  %v179_v17 = vadd.f32 %v147_v13, %v71_v10  ;;  %v1143_v18 = vmul.f32 %v770_v8, %v79_v12 }
  0x71   :  { %320 = vperm.xlu1 %731, %v1064_v16   ;;  %735 = vset.pattern.permute.xlu0 %v953_v20 }
  0x72   :  { %350 = vperm.xlu0 %735, %v1058_v11  }
  0x75   :  { %732 = vset.pattern.permute.xlu1 %v952_v19  ;;  %v774_v19 = vpop.eup %773 }
  0x76   :  { %326 = vperm.xlu1 %732, %v1058_v11   ;;  %738 = vset.pattern.permute.xlu0 %v954_v21 }
  0x77   :  { %386 = vperm.xlu0 %738, %v1064_v16  }
  0x7a   :  { %734 = vset.pattern.permute.xlu1 %v955_v22  ;;  %v81_v22 = vld [vmem:[#allocation7 + $0x28] sm:$0xff] }
  0x7b   :  { %340 = vperm.xlu1 %734, %v1058_v11   ;;  %740 = vset.pattern.permute.xlu0 %v956_v23 }
  0x7c   :  { %406 = vperm.xlu0 %740, %v1058_v11  }
  0x7f   :  { %344 = vperm.xlu1 %734, %v1064_v16  }
  0x80   :  { %743 = vset.pattern.permute.xlu0 %v957_v24 }
  0x81   :  { %420 = vperm.xlu0 %743, %v1064_v16  }
  0x83   :  { %736 = vset.pattern.permute.xlu1 %v953_v20  ;;  %v75_v20 = vld [vmem:[#allocation7 + $0x10] sm:$0xff] }
  0x84   :  { %354 = vperm.xlu1 %736, %v1064_v16  }
  0x85   :  { %745 = vset.pattern.permute.xlu0 %v958_v25 }
  0x86   :  { %458 = vperm.xlu0 %745, %v1058_v11  }
  0x88   :  { %737 = vset.pattern.permute.xlu1 %v954_v21  ;;  %v73_v21 = vld [vmem:[#allocation7 + $0x8] sm:$0xff] }
  0x89   :  { %382 = vperm.xlu1 %737, %v1058_v11  }
  0x8a   :  { %748 = vset.pattern.permute.xlu0 %v959_v26 }
  0x8b   :  { %476 = vperm.xlu0 %748, %v1064_v16  }
  0x8d   :  { %739 = vset.pattern.permute.xlu1 %v960_v27 }
  0x8e   :  { %392 = vperm.xlu1 %739, %v1058_v11  }
  0x8f   :  { %750 = vset.pattern.permute.xlu0 %v961_v28 }
  0x90   :  { %368 = vperm.xlu0 %750, %v1058_v11  }
  0x92   :  { %396 = vperm.xlu1 %739, %v1064_v16  }
  0x94   :  { %753 = vset.pattern.permute.xlu0 %v962_v29 }
  0x95   :  { %438 = vperm.xlu0 %753, %v1064_v16  }
  0x96   :  { %741 = vset.pattern.permute.xlu1 %v956_v23  ;;  %v153_v23 = vsel %vm149_vm1, %v768_v6, %v151_v14 }
  0x97   :  { %410 = vperm.xlu1 %741, %v1064_v16   ;;  %v183_v27 = vadd.f32 %v153_v23, %v73_v21 }
  0x99   :  { %755 = vset.pattern.permute.xlu0 %v963_v32 }
  0x9a   :  { %524 = vperm.xlu0 %755, %v1058_v11  }
  0x9b   :  { %742 = vset.pattern.permute.xlu1 %v957_v24  ;;  %v776_v24 = vpop.eup %775 }
  0x9c   :  { %416 = vperm.xlu1 %742, %v1058_v11   ;;  %v152_v31 = vmul.f32 %v776_v24, %v764_v59  ;;  %v778_v34 = vpop.eup %777 }
  0x9d   :  { %v780_v42 = vpop.eup %779  ;;  %v194_v46 = vmul.f32 %v778_v34, %v79_v12 }
  0x9e   :  { %v154_v47 = vsel %vm150_vm3, %v776_v24, %v152_v31  ;;  %v202_v53 = vmul.f32 %v780_v42, %v81_v22 }
  0x9f   :  { %v206_v57 = vmul.f32 0.5, %v194_v46 }
  0xa0   :  { %744 = vset.pattern.permute.xlu1 %v964_v37  ;;  %v212_v4 = vmul.f32 0.5, %v202_v53 }
  0xa1   :  { %448 = vperm.xlu1 %744, %v1058_v11  }
  0xa5   :  { %452 = vperm.xlu1 %744, %v1064_v16  }
  0xa9   :  { %746 = vset.pattern.permute.xlu1 %v958_v25  ;;  %v146_v25 = vmul.f32 %v772_v15, %v762_v56 }
  0xaa   :  { %462 = vperm.xlu1 %746, %v1064_v16  }
  0xab   :  { %v148_v35 = vsel %vm144_vm2, %v772_v15, %v146_v25 }
  0xac   :  { %v180_v45 = vadd.f32 %v148_v35, %v71_v10  ;;  %v1183_v35 = vmul.f32 %v202_v53, %v194_v46 }
  0xae   :  { %747 = vset.pattern.permute.xlu1 %v959_v26  ;;  %v181_v26 = vmul.f32 %v179_v17, %v75_v20  ;;  %v182_v56 = vmul.f32 %v180_v45, %v75_v20 }
  0xaf   :  { %472 = vperm.xlu1 %747, %v1058_v11  }
  0xb0   :  { %v1163_v6 = vsub.f32 %v182_v56, %v206_v57  ;;  %v1165_v7 = vadd.f32 %v206_v57, %v182_v56  ;;  %v1211_v57 = vld [vmem:[#allocation2 + $0x30] sm:$0xff] }
  0xb1   :  { %1460 = vst [vmem:[#allocation19_spill] sm:$0xff] %v1211_v57 }
  0xb3   :  { %749 = vset.pattern.permute.xlu1 %v965_v52  ;;  %v184_v52 = vadd.f32 %v154_v47, %v73_v21 }
  0xb4   :  { %482 = vperm.xlu1 %749, %v1058_v11  }
  0xb8   :  { %486 = vperm.xlu1 %749, %v1064_v16  }
  0xbc   :  { %751 = vset.pattern.permute.xlu1 %v961_v28  ;;  %v201_v28 = vmul.f32 %v774_v19, %v81_v22 }
  0xbd   :  { %372 = vperm.xlu1 %751, %v1064_v16  }
  0xbe   :  { %v211_v40 = vmul.f32 0.5, %v201_v28  ;;  %v1176_v25 = vmul.f32 %v201_v28, %v1143_v18 }
  0xc0   :  { %1456 = vst [vmem:[#allocation15_spill] sm:$0xff] %v1176_v25 }
  0xc1   :  { %752 = vset.pattern.permute.xlu1 %v962_v29  ;;  %v77_v29 = vld [vmem:[#allocation7 + $0x18] sm:$0xff] }
  0xc2   :  { %434 = vperm.xlu1 %752, %v1058_v11   ;;  %v185_v39 = vmul.f32 %v183_v27, %v77_v29  ;;  %v186_v3 = vmul.f32 %v184_v52, %v77_v29  ;;  %v1206_v52 = vld [vmem:[#allocation2 + $0x28] sm:$0xff] }
  0xc3   :  { %1459 = vst [vmem:[#allocation18_spill] sm:$0xff] %v1206_v52 }
  0xc4   :  { %v1159_v51 = vadd.f32 %v211_v40, %v185_v39  ;;  %v1167_v13 = vadd.f32 %v212_v4, %v186_v3  ;;  %v1171_v17 = vsub.f32 %v186_v3, %v212_v4  ;;  %v1220_v4 = vld [vmem:[#allocation2 + $0x68] sm:$0xff] }
  0xc5   :  { %1462 = vst [vmem:[#allocation21_spill] sm:$0xff] %v1220_v4 }
  0xc6   :  { %754 = vset.pattern.permute.xlu1 %v966_v9 }
  0xc7   :  { %500 = vperm.xlu1 %754, %v1058_v11   ;;  %v205_v11 = vmul.f32 0.5, %v1143_v18 }
  0xc9   :  { %v1151_v37 = vsub.f32 %v181_v26, %v205_v11  ;;  %v1153_v38 = vadd.f32 %v205_v11, %v181_v26 }
  0xcb   :  { %504 = vperm.xlu1 %754, %v1064_v16  }
  0xcf   :  { %756 = vset.pattern.permute.xlu1 %v963_v32 }
  0xd0   :  { %528 = vperm.xlu1 %756, %v1064_v16   ;;  %v1157_v16 = vsub.f32 %v185_v39, %v211_v40 }
  0xd3   :  { %v261_v43 = vpop.permute.xlu1 %260  ;;  %v251_v44 = vpop.permute.xlu0 %250 }
  0xd4   :  { %v267_v32 = vmax.f32 %v1151_v37, %v261_v43  ;;  %v257_v48 = vmin.f32 %v1153_v38, %v251_v44 }
  0xd6   :  { %v269_v62 = vsub.f32 %v257_v48, %v267_v32  ;;  %v1204_v48 = vld [vmem:[#allocation2 + $0x20] sm:$0xff] }
  0xd7   :  { %v541_v56 = vand.u32 2147483647, %v1204_v48 }
  0xd8   :  { %v285_v58 = vpop.permute.xlu1 %284  ;;  %v275_v59 = vpop.permute.xlu0 %274  ;;  %v271_v8 = vmax.f32 %v269_v62, 0.0  ;;  %v1216_v62 = vld [vmem:[#allocation2 + $0x38] sm:$0xff] }
  0xd9   :  { %v291_v63 = vmax.f32 %v1157_v16, %v285_v58  ;;  %v281_v2 = vmin.f32 %v1159_v51, %v275_v59  ;;  %v1213_v58 = vld [vmem:[#allocation2 + $0x60] sm:$0xff]  ;;  %v601_v59 = vand.u32 2147483647, %v1206_v52  ;;  %1461 = vst [vmem:[#allocation20_spill] sm:$0xff] %v1216_v62 }
  0xda   :  { %v542_v3 = vand.u32 2147483647, %v1213_v58 }
  0xdb   :  { %v293_v5 = vsub.f32 %v281_v2, %v291_v63  ;;  %v602_v63 = vand.u32 2147483647, %v1211_v57  ;;  %v543_v2 = vsub.f32 0.0, %v541_v56 }
  0xdd   :  { %v295_v9 = vmax.f32 %v293_v5, 0.0  ;;  %v265_v10 = vpop.permute.xlu1 %264  ;;  %v255_v12 = vpop.permute.xlu0 %254 }
  0xde   :  { %v268_v14 = vmax.f32 %v1163_v6, %v265_v10  ;;  %v258_v15 = vmin.f32 %v1165_v7, %v255_v12  ;;  %v607_v10 = vsub.f32 0.0, %v601_v59  ;;  %v1228_v12 = vld [vmem:[#allocation2 + $0x78] sm:$0xff] }
  0xdf   :  { %v297_v19 = vmul.f32 %v295_v9, %v271_v8  ;;  %v1226_v9 = vld [vmem:[#allocation2 + $0x70] sm:$0xff]  ;;  %1464 = vst [vmem:[#allocation23_spill] sm:$0xff] %v1228_v12 }
  0xe0   :  { %v270_v22 = vsub.f32 %v258_v15, %v268_v14  ;;  %1463 = vst [vmem:[#allocation22_spill] sm:$0xff] %v1226_v9  ;;  %v603_v14 = vand.u32 2147483647, %v1216_v62  ;;  %v604_v15 = vand.u32 2147483647, %v1220_v4 }
  0xe1   :  { %v1178_v31 = vmul.f32 3.0, %v297_v19  ;;  %v608_v19 = vsub.f32 0.0, %v602_v63 }
  0xe2   :  { %v279_v20 = vpop.permute.xlu1 %278  ;;  %v289_v21 = vpop.permute.xlu0 %288  ;;  %v272_v11 = vmax.f32 %v270_v22, 0.0  ;;  %v605_v22 = vand.u32 2147483647, %v1226_v9 }
  0xe3   :  { %v282_v23 = vmin.f32 %v1167_v13, %v279_v20  ;;  %v292_v24 = vmax.f32 %v1171_v17, %v289_v21  ;;  %1457 = vst [vmem:[#allocation16_spill] sm:$0xff] %v1178_v31  ;;  %v545_v20 = vmul.f32 1.442695, %v543_v2  ;;  %v544_v21 = vsub.f32 0.0, %v542_v3  ;;  %v99_v31 = vld [vmem:[#allocation5 + $0x48] sm:$0xff] }
  0xe4   :  { %v611_v56 = vsub.f32 0.0, %v605_v22 }
  0xe5   :  { %v294_v26 = vsub.f32 %v282_v23, %v292_v24  ;;  %v606_v24 = vand.u32 2147483647, %v1228_v12  ;;  %781 = vpow2.f32 %v545_v20  ;;  %v155_v12 = vmax.f32 %v1091_v30, 0.0 }
  0xe6   :  { %v621_v28 = vmul.f32 1.442695, %v611_v56 }
  0xe7   :  { %v296_v27 = vmax.f32 %v294_v26, 0.0  ;;  %v303_v29 = vpop.permute.xlu1 %302  ;;  %v1222_v5 = vpop.permute.xlu0 %316  ;;  %v613_v26 = vmul.f32 1.442695, %v607_v10  ;;  %v612_v59 = vsub.f32 0.0, %v606_v24 }
  0xe8   :  { %v1181_v34 = vadd.f32 %v303_v29, %v1176_v25  ;;  %v610_v29 = vsub.f32 0.0, %v604_v15 }
  0xe9   :  { %v298_v39 = vmul.f32 %v296_v27, %v272_v11  ;;  %v609_v11 = vsub.f32 0.0, %v603_v14  ;;  %783 = vpow2.f32 %v613_v26  ;;  %v623_v10 = vmul.f32 1.442695, %v612_v59  ;;  %v101_v59 = vld [vmem:[#allocation5 + $0x8] sm:$0xff] }
  0xea   :  { %1458 = vst [vmem:[#allocation17_spill] sm:$0xff] %v1181_v34  ;;  %v619_v40 = vmul.f32 1.442695, %v610_v29 }
  0xeb   :  { %v307_v42 = vpop.permute.xlu1 %306  ;;  %v1187_v43 = vmul.f32 3.0, %v298_v39  ;;  %v615_v39 = vmul.f32 1.442695, %v608_v19  ;;  %v617_v2 = vmul.f32 1.442695, %v609_v11 }
  0xec   :  { %v1190_v18 = vadd.f32 %v307_v42, %v1183_v35  ;;  %v1236_v27 = vpop.permute.xlu0 %330  ;;  %v547_v42 = vmul.f32 1.442695, %v544_v21 }
  0xed   :  { %785 = vpow2.f32 %v615_v39 }
  0xee   :  { %787 = vpow2.f32 %v547_v42 }
  0xef   :  { %789 = vpow2.f32 %v617_v2  ;;  %v782_v19 = vpop.eup %781 }
  0xf0   :  { %v1194_v44 = vpop.permute.xlu1 %320  ;;  %791 = vpow2.f32 %v619_v40  ;;  %v549_v24 = vadd.f32 1.0, %v782_v19  ;;  %v1255_v19 = vld [vmem:[#allocation5 + $0x20] sm:$0xff] }
  0xf1   :  { %v1240_v3 = vpop.permute.xlu0 %350  ;;  %793 = vpow2.f32 %v621_v28  ;;  %v98_v28 = vld [vmem:[#allocation5] sm:$0xff]  ;;  %1466 = vst [vmem:[#allocation25_spill] sm:$0xff] %v1255_v19 }
  0xf2   :  { %795 = vpow2.f32 %v623_v10  ;;  %v104_v10 = vld [vmem:[#allocation5 + $0x10] sm:$0xff]  ;;  %v157_v9 = vmul.f32 %v98_v28, %v1091_v30  ;;  %v158_v28 = vmul.f32 %v99_v31, %v1101_v36 }
  0xf3   :  { %797 = vlog2.f32 %v1113_v50  ;;  %v784_v20 = vpop.eup %783  ;;  %v557_v4 = vsub.f32 %v1111_v49, %v104_v10  ;;  %v156_v10 = vmax.f32 %v1101_v36, 0.0  ;;  %v537_v36 = vmul.f32 %v1255_v19, %v1204_v48  ;;  %v105_v19 = vld [vmem:[#allocation5 + $0x58] sm:$0xff] }
  0xf4   :  { %799 = vlog2.f32 %v1120_v55  ;;  %v625_v11 = vadd.f32 1.0, %v784_v20  ;;  %v107_v20 = vld [vmem:[#allocation5 + $0x18] sm:$0xff] }
  0xf5   :  { %v1196_v45 = vpop.permute.xlu1 %326  ;;  %801 = vlog2.f32 %v1127_v61  ;;  %v167_v61 = vmax.f32 %v1096_v33, 0.0  ;;  %v160_v57 = vsub.f32 %v156_v10, %v158_v28 }
  0xf6   :  { %v1244_v15 = vpop.permute.xlu0 %386  ;;  %803 = vlog2.f32 %v549_v24 }
  0xf7   :  { %v786_v22 = vpop.eup %785  ;;  %805 = vlog2.f32 %v625_v11 }
  0xf8   :  { %v788_v26 = vpop.eup %787  ;;  %v626_v42 = vadd.f32 1.0, %v786_v22  ;;  %807 = vlog2.f32 %v1133_v1  ;;  %v169_v22 = vmul.f32 %v101_v59, %v1096_v33  ;;  %v561_v33 = vsub.f32 %v1118_v54, %v107_v20 }
  0xf9   :  { %v790_v39 = vpop.eup %789  ;;  %v550_v50 = vadd.f32 1.0, %v788_v26  ;;  %v324_v54 = vmin.f32 %v1165_v7, %v1194_v44  ;;  %v333_v44 = vmax.f32 %v1151_v37, %v1196_v45 }
  0xfa   :  { %v1198_v47 = vpop.permute.xlu1 %340  ;;  %v792_v56 = vpop.eup %791  ;;  %v1262_v24 = vadd.f32 1.0, %v790_v39  ;;  %809 = vlog2.f32 %v626_v42  ;;  %v159_v42 = vsub.f32 %v155_v12, %v157_v9  ;;  %v171_v25 = vsub.f32 %v167_v61, %v169_v22 }
  0xfb   :  { %v1250_v29 = vpop.permute.xlu0 %406  ;;  %v794_v2 = vpop.eup %793  ;;  %811 = vlog2.f32 %v550_v50  ;;  %v1269_v62 = vadd.f32 1.0, %v792_v56  ;;  %v1281_v56 = vld [vmem:[#allocation5 + $0x68] sm:$0xff]  ;;  %v559_v12 = vmul.f32 %v557_v4, %v557_v4  ;;  %v535_v50 = vmax.f32 %v1204_v48, 0.0 }
  0xfc   :  { %v796_v55 = vpop.eup %795  ;;  %v1271_v30 = vadd.f32 1.0, %v794_v2  ;;  %1467 = vst [vmem:[#allocation26_spill] sm:$0xff] %v1281_v56  ;;  %v102_v2 = vld [vmem:[#allocation5 + $0x50] sm:$0xff]  ;;  %v563_v31 = vmul.f32 %v561_v33, %v561_v33  ;;  %v168_v4 = vmax.f32 %v1105_v41, 0.0  ;;  %v347_v48 = vmin.f32 %v1159_v51, %v1198_v47 }
  0xfd   :  { %v798_v34 = vpop.eup %797  ;;  %v1275_v39 = vadd.f32 1.0, %v796_v55  ;;  %v1328_v45 = vmul.f32 %v1281_v56, %v1213_v58  ;;  %813 = vlog2.f32 %v1262_v24 }
  0xfe   :  { %v1200_v46 = vpop.permute.xlu1 %344  ;;  %v800_v1 = vpop.eup %799  ;;  %v162_v59 = vmul.f32 0.6931472, %v798_v34  ;;  %v334_v34 = vmax.f32 %v1163_v6, %v1236_v27  ;;  %815 = vlog2.f32 %v1269_v62 }
  0xff   :  { %v174_v9 = vmul.f32 0.6931472, %v800_v1  ;;  %v802_v55 = vpop.eup %801  ;;  %v170_v1 = vmul.f32 %v102_v2, %v1105_v41  ;;  %817 = vlog2.f32 %v1271_v30 }
 0x100   :  { %v1264_v26 = vpop.permute.xlu0 %420  ;;  %v804_v61 = vpop.eup %803  ;;  %v1299_v27 = vadd.f32 %v162_v59, %v159_v42  ;;  %v323_v42 = vmin.f32 %v1153_v38, %v1222_v5  ;;  %v336_v59 = vsub.f32 %v324_v54, %v334_v34  ;;  %v164_v41 = vmul.f32 0.6931472, %v802_v55 }
 0x101   :  { %v1321_v28 = vmul.f32 0.6931472, %v804_v61  ;;  %v1330_v34 = vadd.f32 %v174_v9, %v171_v25  ;;  %v424_v56 = vmax.f32 %v1171_v17, %v1264_v26  ;;  %819 = vlog2.f32 %v1275_v39  ;;  %v581_v39 = vld [vmem:[#allocation5 + $0x80] sm:$0xff] }
 0x102   :  { %v338_v61 = vmax.f32 %v336_v59, 0.0 }
 0x103   :  { %v1202_v32 = vpop.permute.xlu1 %354  ;;  %1469 = vst [vmem:[#allocation28_spill] sm:$0xff] %v1321_v28 }
 0x104   :  { %v358_v49 = vmax.f32 %v1171_v17, %v1202_v32  ;;  %v348_v32 = vmin.f32 %v1167_v13, %v1200_v46  ;;  %v1303_v46 = vpop.eup %805 }
 0x105   :  { %v1296_v22 = vpop.permute.xlu0 %458  ;;  %v808_v52 = vpop.eup %807 }
 0x106   :  { %v360_v33 = vsub.f32 %v348_v32, %v358_v49  ;;  %v1313_v2 = vpop.eup %809  ;;  %v1319_v49 = vsub.f32 %v535_v50, %v537_v36  ;;  %v108_v50 = vld [vmem:[#allocation5 + $0x60] sm:$0xff]  ;;  %v172_v36 = vsub.f32 %v168_v4, %v170_v1  ;;  %v176_v54 = vmul.f32 0.6931472, %v808_v52 }
 0x107   :  { %v1323_v10 = vpop.eup %811  ;;  %v390_v52 = vmin.f32 %v1165_v7, %v1244_v15 }
 0x108   :  { %v1208_v53 = vpop.permute.xlu1 %382  ;;  %1468 = vst [vmem:[#allocation27_spill] sm:$0xff] %v1319_v49  ;;  %1470 = vst [vmem:[#allocation29_spill] sm:$0xff] %v1323_v10  ;;  %v362_v32 = vmax.f32 %v360_v33, 0.0  ;;  %v335_v10 = vsub.f32 %v323_v42, %v333_v44  ;;  %v1335_v49 = vadd.f32 %v164_v41, %v160_v57  ;;  %v562_v44 = vsub.f32 %v1131_v0, %v108_v50 }
 0x109   :  { %v389_v25 = vmin.f32 %v1153_v38, %v1208_v53  ;;  %v565_v57 = vadd.f32 %v563_v31, %v559_v12  ;;  %v465_v53 = vmax.f32 %v1151_v37, %v1296_v22 }
 0x10a   :  { %v477_v28 = vpop.permute.xlu0 %476  ;;  %v364_v1 = vmul.f32 %v362_v32, %v338_v61  ;;  %v337_v0 = vmax.f32 %v335_v10, 0.0  ;;  %v577_v61 = vld [vmem:[#allocation5 + $0x30] sm:$0xff] }
 0x10b   :  { %v480_v15 = vmin.f32 %v1167_v13, %v477_v28 }
 0x10d   :  { %v1224_v8 = vpop.permute.xlu1 %392 }
 0x10f   :  { %v369_v33 = vpop.permute.xlu0 %368 }
 0x111   :  { %v1233_v23 = vpop.permute.xlu1 %396 }
 0x116   :  { %v1238_v63 = vpop.permute.xlu1 %410 }
 0x11b   :  { %v1242_v14 = vpop.permute.xlu1 %416 }
 0x11c   :  { %v423_v47 = vmax.f32 %v1157_v16, %v1242_v14  ;;  %v399_v14 = vmax.f32 %v1151_v37, %v1224_v8 }
 0x11e   :  { %v401_v26 = vsub.f32 %v389_v25, %v399_v14  ;;  %v578_v25 = vld [vmem:[#allocation5 + $0x38] sm:$0xff] }
 0x120   :  { %v1247_v21 = vpop.permute.xlu1 %448 }
 0x124   :  { %v1252_v40 = vpop.permute.xlu1 %452 }
 0x125   :  { %1465 = vst [vmem:[#allocation24_spill] sm:$0xff] %v1252_v40  ;;  %v357_v40 = vmax.f32 %v1157_v16, %v1240_v3  ;;  %v413_v3 = vmin.f32 %v1159_v51, %v1250_v29  ;;  %v558_v29 = vsub.f32 %v1125_v60, %v105_v19  ;;  %v414_v60 = vmin.f32 %v1167_v13, %v1238_v63 }
 0x126   :  { %v400_v63 = vmax.f32 %v1163_v6, %v1233_v23  ;;  %v403_v23 = vmax.f32 %v401_v26, 0.0  ;;  %v1471_v13 = vsub.f32 %v1187_v43, %v1190_v18 }
 0x127   :  { %v359_v55 = vsub.f32 %v347_v48, %v357_v40  ;;  %v425_v40 = vsub.f32 %v413_v3, %v423_v47  ;;  %v1344_v9 = vmul.f32 %v558_v29, %v558_v29  ;;  %v426_v12 = vsub.f32 %v414_v60, %v424_v56 }
 0x129   :  { %v1266_v11 = vpop.permute.xlu1 %462  ;;  %v361_v4 = vmax.f32 %v359_v55, 0.0  ;;  %v427_v31 = vmax.f32 %v425_v40, 0.0  ;;  %v428_v62 = vmax.f32 %v426_v12, 0.0  ;;  %v1371_v55 = vadd.f32 %v176_v54, %v172_v36  ;;  %v439_v54 = vpop.permute.xlu0 %438 }
 0x12a   :  { %v466_v56 = vmax.f32 %v1163_v6, %v1266_v11  ;;  %v1474_v6 = vld [vmem:[#allocation20_spill] sm:$0xff]  ;;  %v564_v40 = vmul.f32 %v562_v44, %v562_v44  ;;  %v1380_v12 = vmul.f32 0.5, %v565_v57  ;;  %v1482_v57 = vld [vmem:[#allocation23_spill] sm:$0xff] }
 0x12b   :  { %v363_v22 = vmul.f32 %v361_v4, %v337_v0  ;;  %v429_v3 = vmul.f32 %v427_v31, %v403_v23  ;;  %v585_v11 = vmax.f32 %v1474_v6, 0.0  ;;  %v1479_v31 = vld [vmem:[#allocation18_spill] sm:$0xff] }
 0x12c   :  { %v1473_v47 = vld [vmem:[#allocation24_spill] sm:$0xff] }
 0x12d   :  { %v456_v28 = vmin.f32 %v1165_v7, %v1473_v47  ;;  %v365_v29 = vmul.f32 3.0, %v363_v22  ;;  %v431_v26 = vmul.f32 3.0, %v429_v3  ;;  %v579_v22 = vld [vmem:[#allocation5 + $0x40] sm:$0xff] }
 0x12e   :  { %v1291_v20 = vpop.permute.xlu1 %472 }
 0x12f   :  { %v479_v48 = vmin.f32 %v1159_v51, %v1291_v20  ;;  %v402_v51 = vsub.f32 %v390_v52, %v400_v63  ;;  %v314_v20 = vmax.f32 %v1471_v13, -1.0  ;;  %v468_v18 = vsub.f32 %v456_v28, %v466_v56  ;;  %v1476_v63 = vld [vmem:[#allocation16_spill] sm:$0xff] }
 0x130   :  { %v442_v13 = vadd.f32 %v439_v54, %v1183_v35 }
 0x131   :  { %v404_v32 = vmax.f32 %v402_v51, 0.0 }
 0x133   :  { %v483_v5 = vpop.permute.xlu1 %482  ;;  %v430_v36 = vmul.f32 %v428_v62, %v404_v32 }
 0x134   :  { %v489_v8 = vmax.f32 %v1157_v16, %v483_v5  ;;  %v455_v16 = vmin.f32 %v1153_v38, %v1247_v21  ;;  %v366_v38 = vmul.f32 3.0, %v364_v1 }
 0x135   :  { %v432_v3 = vmul.f32 3.0, %v430_v36 }
 0x136   :  { %v491_v42 = vsub.f32 %v479_v48, %v489_v8  ;;  %v467_v21 = vsub.f32 %v455_v16, %v465_v53  ;;  %v580_v8 = vld [vmem:[#allocation5 + $0x78] sm:$0xff]  ;;  %v814_v53 = vpop.eup %813  ;;  %v1477_v16 = vld [vmem:[#allocation17_spill] sm:$0xff] }
 0x137   :  { %v487_v19 = vpop.permute.xlu1 %486  ;;  %v1478_v48 = vsub.f32 %v1476_v63, %v1477_v16  ;;  %v444_v36 = vsub.f32 %v432_v3, %v442_v13 }
 0x138   :  { %v490_v37 = vmax.f32 %v1171_v17, %v487_v19  ;;  %v1472_v17 = vld [vmem:[#allocation15_spill] sm:$0xff]  ;;  %v493_v10 = vmax.f32 %v491_v42, 0.0  ;;  %v469_v43 = vmax.f32 %v467_v21, 0.0  ;;  %v1475_v19 = vld [vmem:[#allocation21_spill] sm:$0xff]  ;;  %v816_v42 = vpop.eup %815 }
 0x139   :  { %v375_v41 = vadd.f32 %v369_v33, %v1472_v17  ;;  %v586_v4 = vmax.f32 %v1475_v19, 0.0  ;;  %v313_v0 = vmax.f32 %v1478_v48, -1.0  ;;  %v1480_v33 = vld [vmem:[#allocation19_spill] sm:$0xff]  ;;  %v592_v21 = vmul.f32 %v580_v8, %v1475_v19  ;;  %v818_v56 = vpop.eup %817 }
 0x13a   :  { %v492_v30 = vsub.f32 %v480_v15, %v490_v37  ;;  %v495_v1 = vmul.f32 %v493_v10, %v469_v43  ;;  %v589_v15 = vmul.f32 %v577_v61, %v1479_v31  ;;  %v590_v44 = vmul.f32 %v578_v25, %v1480_v33 }
 0x13b   :  { %v377_v60 = vsub.f32 %v365_v29, %v375_v41  ;;  %v470_v37 = vmax.f32 %v468_v18, 0.0  ;;  %v588_v41 = vmax.f32 %v1482_v57, 0.0  ;;  %v1483_v29 = vmax.f32 %v1479_v31, 0.0  ;;  %v525_v31 = vpop.permute.xlu0 %524 }
 0x13c   :  { %v373_v59 = vpop.permute.xlu1 %372  ;;  %v494_v52 = vmax.f32 %v492_v30, 0.0  ;;  %v497_v47 = vmul.f32 3.0, %v495_v1  ;;  %v591_v30 = vmul.f32 %v579_v22, %v1474_v6  ;;  %v1484_v43 = vmax.f32 %v1480_v33, 0.0 }
 0x13d   :  { %v376_v24 = vadd.f32 %v373_v59, %v1183_v35  ;;  %v582_v59 = vld [vmem:[#allocation5 + $0x88] sm:$0xff]  ;;  %v595_v32 = vsub.f32 %v1483_v29, %v589_v15  ;;  %v598_v25 = vsub.f32 %v586_v4, %v592_v21  ;;  %v638_v54 = vmul.f32 0.6931472, %v816_v42 }
 0x13e   :  { %v496_v10 = vmul.f32 %v494_v52, %v470_v37  ;;  %v596_v18 = vsub.f32 %v1484_v43, %v590_v44  ;;  %v640_v6 = vmul.f32 0.6931472, %v818_v56  ;;  %v597_v63 = vsub.f32 %v585_v11, %v591_v30 }
 0x13f   :  { %v378_v5 = vsub.f32 %v366_v38, %v376_v24  ;;  %v1481_v38 = vld [vmem:[#allocation22_spill] sm:$0xff]  ;;  %v379_v24 = vmax.f32 %v313_v0, %v377_v60  ;;  %v632_v60 = vmul.f32 0.6931472, %v1303_v46  ;;  %v653_v4 = vadd.f32 %v1330_v34, %v1299_v27 }
 0x140   :  { %v587_v51 = vmax.f32 %v1481_v38, 0.0  ;;  %v593_v62 = vmul.f32 %v581_v39, %v1481_v38  ;;  %v566_v39 = vadd.f32 %v564_v40, %v1344_v9  ;;  %v636_v33 = vmul.f32 0.6931472, %v814_v53  ;;  %v83_v40 = vld [vmem:[#allocation7 + $0x30] sm:$0xff] }
 0x141   :  { %v380_v14 = vmax.f32 %v314_v20, %v378_v5  ;;  %v435_v50 = vpop.permute.xlu1 %434  ;;  %v594_v5 = vmul.f32 %v582_v59, %v1482_v57  ;;  %v643_v0 = vadd.f32 %v632_v60, %v595_v32  ;;  %v646_v9 = vadd.f32 %v638_v54, %v598_v25  ;;  %v1487_v59 = vld [vmem:[#allocation27_spill] sm:$0xff]  ;;  %v1488_v38 = vld [vmem:[#allocation28_spill] sm:$0xff] }
 0x142   :  { %v441_v7 = vadd.f32 %v435_v50, %v1472_v17  ;;  %v599_v19 = vsub.f32 %v587_v51, %v593_v62  ;;  %v555_v27 = vadd.f32 %v1488_v38, %v1487_v59  ;;  %v1489_v34 = vmax.f32 %v1213_v58, 0.0  ;;  %v1490_v51 = vld [vmem:[#allocation29_spill] sm:$0xff] }
 0x143   :  { %v600_v16 = vsub.f32 %v588_v41, %v594_v5  ;;  %v446_v46 = vmax.f32 %v380_v14, %v444_v36  ;;  %v554_v21 = vmul.f32 0.6931472, %v1490_v51  ;;  %v568_v53 = vmul.f32 0.5, %v566_v39  ;;  %v113_v58 = vld [vmem:[#allocation5 + $0x28] sm:$0xff] }
 0x144   :  { %v443_v23 = vsub.f32 %v431_v26, %v441_v7  ;;  %v820_v7 = vpop.eup %819  ;;  %v498_v26 = vmul.f32 3.0, %v496_v10  ;;  %v647_v11 = vadd.f32 %v640_v6, %v599_v19  ;;  %v540_v14 = vsub.f32 %v1489_v34, %v1328_v45 }
 0x145   :  { %v642_v44 = vmul.f32 0.6931472, %v820_v7  ;;  %v645_v57 = vadd.f32 %v636_v33, %v597_v63  ;;  %v655_v62 = vadd.f32 %v653_v4, %v1380_v12 }
 0x146   :  { %v501_v20 = vpop.permute.xlu1 %500  ;;  %v445_v50 = vmax.f32 %v379_v24, %v443_v23  ;;  %v1485_v23 = vld [vmem:[#allocation25_spill] sm:$0xff]  ;;  %v654_v24 = vadd.f32 %v1371_v55, %v1335_v49  ;;  %v651_v30 = vadd.f32 %v647_v11, %v646_v9  ;;  %v556_v43 = vadd.f32 %v554_v21, %v540_v14 }
 0x147   :  { %v507_v28 = vadd.f32 %v501_v20, %v1472_v17  ;;  %v634_v17 = vmul.f32 0.6931472, %v1313_v2  ;;  %v967_v2 = vmov 0.0   ;;  %v648_v45 = vadd.f32 %v642_v44, %v600_v16 }
 0x148   :  { %v656_v32 = vadd.f32 %v654_v24, %v568_v53  ;;  %v657_v49 = vmul.f32 %v655_v62, %v113_v58 }
 0x149   :  { %v509_v61 = vsub.f32 %v497_v47, %v507_v28  ;;  %v644_v42 = vadd.f32 %v634_v17, %v596_v18  ;;  %v1491_v47 = vld [vmem:[#allocation26_spill] sm:$0xff]  ;;  %v652_v25 = vadd.f32 %v651_v30, %v648_v45 }
 0x14a   :  { %v505_v8 = vpop.permute.xlu1 %504  ;;  %v1492_v28 = vsub.f32 1.0, %v1491_v47  ;;  %v114_v18 = vld [vmem:[#allocation5 + $0x70] sm:$0xff] }
 0x14b   :  { %v511_v52 = vmax.f32 %v445_v50, %v509_v61  ;;  %v508_v1 = vadd.f32 %v505_v8, %v1183_v35  ;;  %v1486_v35 = vsub.f32 1.0, %v1485_v23  ;;  %v649_v41 = vadd.f32 %v644_v42, %v643_v0 }
 0x14c   :  { %v658_v60 = vmul.f32 %v656_v32, %v114_v18  ;;  %v666_v17 = vmul.f32 %v652_v25, %v1491_v47 }
 0x14d   :  { %v510_v48 = vsub.f32 %v498_v26, %v508_v1  ;;  %vm515_vm4 = vcmp.lt.f32.partialorder %v511_v52, 0.0  ;;  %v650_v61 = vadd.f32 %v649_v41, %v645_v57 }
 0x14e   :  { %v689_v15 = vsel %vm515_vm4, 1.0, %v967_v2 }
 0x14f   :  { %v512_v37 = vmax.f32 %v446_v46, %v510_v48  ;;  %v521_v22 = vmul.f32 %v689_v15, %v1486_v35  ;;  %v529_v13 = vpop.permute.xlu1 %528  ;;  %v665_v19 = vmul.f32 %v650_v61, %v1485_v23 }
 0x151   :  { %v531_v56 = vmul.f32 %v525_v31, %v521_v22  ;;  %vm516_vm5 = vcmp.lt.f32.partialorder %v512_v37, 0.0 }
 0x152   :  { %v690_v20 = vsel %vm516_vm5, 1.0, %v967_v2 }
 0x153   :  { %v533_v3 = vmul.f32 %v531_v56, %v83_v40  ;;  %v522_v10 = vmul.f32 %v690_v20, %v1492_v28 }
 0x155   :  { %v659_v5 = vadd.f32 %v533_v3, %v1485_v23  ;;  %v532_v29 = vmul.f32 %v529_v13, %v522_v10 }
 0x157   :  { %v661_v55 = vmul.f32 %v659_v5, %v555_v27  ;;  %v534_v50 = vmul.f32 %v532_v29, %v83_v40 }
 0x159   :  { %v660_v12 = vadd.f32 %v534_v50, %v1491_v47  ;;  %v663_v8 = vadd.f32 %v661_v55, %v657_v49 }
 0x15b   :  { %v662_v7 = vmul.f32 %v660_v12, %v556_v43  ;;  %v667_v6 = vadd.f32 %v665_v19, %v663_v8 }
 0x15d   :  { %v664_v54 = vadd.f32 %v662_v7, %v658_v60 }
 0x15f   :  { %v668_v36 = vadd.f32 %v666_v17, %v664_v54 }
 0x161   :  { %v669_v52 = vadd.f32 %v668_v36, %v667_v6 }
 0x163   :  { %670 = vst [vmem:[#allocation10] sm:$0xff] %v669_v52 }
 0x164   :  { %920 = shalt.err (!%p917_p8)
}
 0x165   :  { %s921_s13 = scalar_lea.hbm %s1435_s4, 128 }
 0x166   :  { %p922_p9 = scmp.ne.s32.totalorder %s1435_s4, %s921_s13  ;;  %p925_p10 = scmp.lt.u32.totalorder %s921_s13, %s1435_s4 }
 0x168   :  { %p927_p11 = pnand %p925_p10, %p922_p9 }
 0x16a   :  { %930 = shalt.err (!%p927_p11)
}
 0x16b   :  { %680 = dma.vmem_to_hbm [thread:$0]  %s678_s28, 128, %s1435_s4, [#allocation4]  }
 0x16c   :  { %937 = dma.done.wait [#allocation4], 128  }
 0x16d   :  { %938 = vsyncadd [#allocation4], 4294967168 }
 0x16e   :  { %684 = vsyncpa [#allocation3], 1 }
 0x16f   :  { %685 = vsyncpa [#allocation6], 1 }
 0x170   :  { %686 = vsyncpa [#allocation9], 1 }
 0x171   :  { %687 = vsyncpa [#allocation4], 1 }

</bundles_post_ra>
